<compile_context>
chip_gen: v6e
topology: v6e:2x2x1
jax: 0.10.0
libtpu: 0.0.40
codegen_flags: <defaults>
</compile_context>

<pallas_src>
import functools
import math

import jax
import jax.numpy as jnp
from jax.experimental import pallas as pl
from jax.experimental.pallas import tpu as pltpu

# ---------------- synthetic small-BERT config (shapes only; no checkpoint) ----
B, S = 2, 8                 # batch, sequence length
VOCAB = 128                 # synthetic vocab (real ckpt: 128k)
HIDDEN = 32
N_LAYERS = 2
N_HEADS = 2
HEAD_DIM = HIDDEN // N_HEADS
INTERMEDIATE = 4 * HIDDEN
MAX_POS = 16
NUM_LABELS = 5              # len({'_E', '_I', '_DE', '_DEN', '_S'})
LPAD = 128                  # lane-padded logits / packed-params width
LN_EPS = 1e-12
MASK_BIAS = -1e9

# rows of the packed per-layer small-parameter tile [8, 128]
ROW_BQKV, ROW_BO, ROW_LN1G, ROW_LN1B, ROW_BI, ROW_BO2, ROW_LN2G, ROW_LN2B = range(8)


# ---------------------------- kernel helpers ----------------------------------
def _layernorm(y, g, b):
    mu = jnp.mean(y, axis=-1, keepdims=True)
    var = jnp.mean((y - mu) ** 2, axis=-1, keepdims=True)
    return (y - mu) * jax.lax.rsqrt(var + LN_EPS) * g + b


# ------------------------------- fused kernel ---------------------------------
def _bert_fused_kernel(emb_ref, info_ref, rowb_ref, embln_ref,
                       wqkv_ref, wo_ref, wi_ref, wo2_ref, small_ref,
                       clsw_ref, clsb_ref, labels_ref,
                       logits_ref, loss_ref,
                       x_ref, *,
                       n_heads, head_dim, n_layers, num_labels, scale):
    l = pl.program_id(0)
    H = n_heads * head_dim

    # Layer 0: fold the embedding LayerNorm in (no standalone LN pallas_call).
    @pl.when(l == 0)
    def _():
        embln = embln_ref[...]                               # [2, H]
        x_ref[...] = _layernorm(emb_ref[...], embln[0:1, :], embln[1:2, :])

    x = x_ref[...]                                           # resident activations [M, H]

    # unpack the packed per-layer bias / LN vectors (one [8,128] tile per layer)
    small = small_ref[...]
    bqkv = small[ROW_BQKV:ROW_BQKV + 1, :3 * H]
    bo = small[ROW_BO:ROW_BO + 1, :H]
    ln1g = small[ROW_LN1G:ROW_LN1G + 1, :H]
    ln1b = small[ROW_LN1B:ROW_LN1B + 1, :H]
    bi = small[ROW_BI:ROW_BI + 1, :INTERMEDIATE]
    bo2 = small[ROW_BO2:ROW_BO2 + 1, :H]
    ln2g = small[ROW_LN2G:ROW_LN2G + 1, :H]
    ln2b = small[ROW_LN2B:ROW_LN2B + 1, :H]

    # additive attention bias built in-kernel from [M]-sized vectors:
    # same-batch block structure + key-padding mask (HF extended mask semantics).
    info = info_ref[...]                                     # [2, M]  (batch ids, key mask)
    col_batch = info[0:1, :]
    key_ok = info[1:2, :] > 0.5
    row_batch = rowb_ref[...]                                # [M, 1]
    bias = jnp.where((row_batch == col_batch) & key_ok, 0.0, MASK_BIAS)   # [M, M]

    # ------------------------------ attention --------------------------------
    x16 = x.astype(jnp.bfloat16)
    qkv = jnp.dot(x16, wqkv_ref[...],
                  preferred_element_type=jnp.float32) + bqkv             # [M, 3H]

    ctx_parts = []
    for h in range(n_heads):                                 # static unroll
        lo = h * head_dim
        q_h = qkv[:, lo:lo + head_dim].astype(jnp.bfloat16)
        k_h = qkv[:, H + lo:H + lo + head_dim].astype(jnp.bfloat16)
        v_h = qkv[:, 2 * H + lo:2 * H + lo + head_dim].astype(jnp.bfloat16)
        # contract on dim 1 of both operands: q @ k^T without an explicit transpose
        s = jax.lax.dot_general(q_h, k_h, (((1,), (1,)), ((), ())),
                                preferred_element_type=jnp.float32)
        s = s * scale + bias
        s = s - jnp.max(s, axis=-1, keepdims=True)
        p = jnp.exp(s)
        p = p * pl.reciprocal(jnp.sum(p, axis=-1, keepdims=True), approx=True)
        ctx_parts.append(jnp.dot(p.astype(jnp.bfloat16), v_h,
                                 preferred_element_type=jnp.float32))
    ctx = jnp.concatenate(ctx_parts, axis=-1)                # [M, H] head merge (lane concat)
    attn_out = jnp.dot(ctx.astype(jnp.bfloat16), wo_ref[...],
                       preferred_element_type=jnp.float32) + bo
    x = _layernorm(attn_out + x, ln1g, ln1b)

    # --------------------------------- FFN ------------------------------------
    h1 = jnp.dot(x.astype(jnp.bfloat16), wi_ref[...],
                 preferred_element_type=jnp.float32) + bi
    # TODO(synk): HF BERT default is exact (erf) GELU; tanh approximation used here.
    h1 = jax.nn.gelu(h1, approximate=True)
    ffo = jnp.dot(h1.astype(jnp.bfloat16), wo2_ref[...],
                  preferred_element_type=jnp.float32) + bo2
    x = _layernorm(ffo + x, ln2g, ln2b)
    x_ref[...] = x                                           # carry to next layer

    # ------------------ classifier + cross-entropy (last layer) ---------------
    @pl.when(l == n_layers - 1)
    def _():
        logits = jnp.dot(x.astype(jnp.bfloat16), clsw_ref[...],
                         preferred_element_type=jnp.float32) + clsb_ref[...]   # [M, LPAD]
        logits_ref[...] = logits

        classes = jax.lax.broadcasted_iota(jnp.int32, logits.shape, 1)
        class_ok = classes < num_labels
        xm = jnp.where(class_ok, logits, MASK_BIAS)          # padded cols -> -inf-ish (f32 safe)
        m = jnp.max(xm, axis=-1, keepdims=True)
        lse = jnp.log(jnp.sum(jnp.exp(xm - m), axis=-1, keepdims=True)) + m
        lbl = labels_ref[...]                                # [M, 1] int32, ignore_index = -100
        picked = jnp.sum(jnp.where(classes == lbl, xm, 0.0), axis=-1, keepdims=True)
        valid = lbl != -100
        per_tok = jnp.where(valid, lse - picked, 0.0)
        total = jnp.sum(per_tok, axis=0, keepdims=True)
        count = jnp.sum(valid.astype(jnp.float32), axis=0, keepdims=True)
        loss_ref[...] = total / jnp.maximum(count, 1.0)      # exact divide for the mean


# ----------------------------- model forward ----------------------------------
def bert_forward(params, input_ids, attention_mask, labels):
    M = B * S

    # embeddings: word + position + token_type(=0); LayerNorm happens in-kernel.
    we = jnp.take(params["word_emb"], input_ids, axis=0)             # [B, S, H]
    pe = params["pos_emb"][:S][None]                                  # [1, S, H]
    te = params["type_emb"][0][None, None]                            # [1, 1, H]
    emb = (we + pe + te).reshape(M, HIDDEN)
    # TODO(synk): dropout layers omitted (deterministic / eval semantics).

    # [M]-sized vectors for in-kernel attention-bias construction
    batch_ids = (jnp.arange(M, dtype=jnp.int32) // S).astype(jnp.float32)
    info = jnp.stack([batch_ids,
                      attention_mask.reshape(M).astype(jnp.float32)])  # [2, M]
    rowb = batch_ids.reshape(M, 1)                                     # [M, 1]
    labels2d = labels.reshape(M, 1).astype(jnp.int32)

    kern = functools.partial(
        _bert_fused_kernel, n_heads=N_HEADS, head_dim=HEAD_DIM,
        n_layers=N_LAYERS, num_labels=NUM_LABELS,
        scale=1.0 / math.sqrt(HEAD_DIM))

    def const2d(shape):                       # same block every grid step (resident)
        return pl.BlockSpec(shape, lambda l: (0, 0))

    def per_layer(shape2d):                   # stacked per-layer weights, leading dim squeezed
        return pl.BlockSpec((None,) + shape2d, lambda l: (l, 0, 0))

    grid_spec = pltpu.PrefetchScalarGridSpec(
        num_scalar_prefetch=0,
        grid=(N_LAYERS,),
        in_specs=[
            const2d((M, HIDDEN)),               # emb
            const2d((2, M)),                    # batch ids + key mask
            const2d((M, 1)),                    # row batch ids
            const2d((2, HIDDEN)),               # embedding LN gamma/beta
            per_layer((HIDDEN, 3 * HIDDEN)),    # wqkv  (bf16)
            per_layer((HIDDEN, HIDDEN)),        # wo    (bf16)
            per_layer((HIDDEN, INTERMEDIATE)),  # wi    (bf16)
            per_layer((INTERMEDIATE, HIDDEN)),  # wo2   (bf16)
            per_layer((8, 128)),                # packed per-layer biases / LN params
            const2d((HIDDEN, LPAD)),            # classifier W (lane-padded, bf16)
            const2d((1, LPAD)),                 # classifier b (lane-padded)
            const2d((M, 1)),                    # labels
        ],
        out_specs=(const2d((M, LPAD)),          # logits (lane-dense, written at last layer)
                   const2d((1, 1))),            # loss
        scratch_shapes=[pltpu.VMEM((M, HIDDEN), jnp.float32)],   # resident activations
    )

    logits_pad, loss = pl.pallas_call(
        kern,
        grid_spec=grid_spec,
        out_shape=(jax.ShapeDtypeStruct((M, LPAD), jnp.float32),
                   jax.ShapeDtypeStruct((1, 1), jnp.float32)),
        compiler_params=pltpu.CompilerParams(
            dimension_semantics=("arbitrary",)),   # layers are sequential
    )(emb, info, rowb, params["emb_ln"],
      params["wqkv"], params["wo"], params["wi"], params["wo2"], params["small"],
      params["cls_w_pad"], params["cls_b_pad"], labels2d)

    logits = logits_pad[:, :NUM_LABELS].reshape(B, S, NUM_LABELS)
    # matches HF return_dict=False with labels: (loss, logits)
    return loss[0, 0], logits


# ----------------------------- parameter init ---------------------------------
def init_params(key):
    def nrm(k, shape, dtype=jnp.float32):
        return (0.02 * jax.random.normal(k, shape, jnp.float32)).astype(dtype)

    keys = jax.random.split(key, 8)
    H, H3, I = HIDDEN, 3 * HIDDEN, INTERMEDIATE

    # stacked per-layer weights, stored bf16 (MXU operands; halves DMA bytes)
    wqkv = nrm(keys[3], (N_LAYERS, H, H3), jnp.bfloat16)   # fused Q|K|V projection
    wo = nrm(keys[4], (N_LAYERS, H, H), jnp.bfloat16)
    wi = nrm(keys[5], (N_LAYERS, H, I), jnp.bfloat16)
    wo2 = nrm(keys[6], (N_LAYERS, I, H), jnp.bfloat16)

    # packed per-layer small params [N_LAYERS, 8, 128]: biases zero, LN gammas one
    small = jnp.zeros((N_LAYERS, 8, LPAD), jnp.float32)
    small = small.at[:, ROW_LN1G, :H].set(1.0)
    small = small.at[:, ROW_LN2G, :H].set(1.0)

    # classifier, lane-padded once at init (no per-step pad/scatter in the jit)
    cls_w = nrm(keys[7], (H, NUM_LABELS))
    cls_w_pad = jnp.zeros((H, LPAD), jnp.float32).at[:, :NUM_LABELS].set(cls_w)
    cls_w_pad = cls_w_pad.astype(jnp.bfloat16)
    cls_b_pad = jnp.zeros((1, LPAD), jnp.float32)

    emb_ln = jnp.stack([jnp.ones((H,), jnp.float32),
                        jnp.zeros((H,), jnp.float32)])       # [2, H] gamma/beta

    return {
        "word_emb": nrm(keys[0], (VOCAB, H)),
        "pos_emb": nrm(keys[1], (MAX_POS, H)),
        "type_emb": nrm(keys[2], (2, H)),
        "emb_ln": emb_ln,
        "wqkv": wqkv, "wo": wo, "wi": wi, "wo2": wo2, "small": small,
        "cls_w_pad": cls_w_pad, "cls_b_pad": cls_b_pad,
    }


# ------------------------------------ main -------------------------------------
if __name__ == "__main__":
    key = jax.random.PRNGKey(0)
    pkey, ikey, lkey = jax.random.split(key, 3)

    params = init_params(pkey)
    input_id = jax.random.randint(ikey, (B, S), 0, VOCAB, dtype=jnp.int32)
    mask = jnp.array([[1] * S, [1] * 5 + [0] * 3], dtype=jnp.int32)
    label = jax.random.randint(lkey, (B, S), 0, NUM_LABELS, dtype=jnp.int32)
    label = jnp.where(mask == 1, label, -100)   # ignored positions -> ignore_index

    fwd = jax.jit(bert_forward)
    loss, logits = fwd(params, input_id, mask, label)
    jax.block_until_ready((loss, logits))

    assert logits.shape == (B, S, NUM_LABELS)
    assert loss.shape == ()
    print("KERNEL_OK")
</pallas_src>

<mosaic_0001>
module attributes {stable_mosaic.version = 11 : i64} {
  func.func @_bert_fused_kernel(%arg0: i32, %arg1: memref<16x32xf32, #tpu.memory_space<vmem>>, %arg2: memref<2x16xf32, #tpu.memory_space<vmem>>, %arg3: memref<16x1xf32, #tpu.memory_space<vmem>>, %arg4: memref<2x32xf32, #tpu.memory_space<vmem>>, %arg5: memref<1x32x96xbf16, #tpu.memory_space<vmem>>, %arg6: memref<1x32x32xbf16, #tpu.memory_space<vmem>>, %arg7: memref<1x32x128xbf16, #tpu.memory_space<vmem>>, %arg8: memref<1x128x32xbf16, #tpu.memory_space<vmem>>, %arg9: memref<1x8x128xf32, #tpu.memory_space<vmem>>, %arg10: memref<32x128xbf16, #tpu.memory_space<vmem>>, %arg11: memref<1x128xf32, #tpu.memory_space<vmem>>, %arg12: memref<16x1xi32, #tpu.memory_space<vmem>>, %arg13: memref<16x128xf32, #tpu.memory_space<vmem>>, %arg14: memref<1x1xf32, #tpu.memory_space<vmem>>, %arg15: memref<16x32xf32, #tpu.memory_space<vmem>>) attributes {dimension_semantics = [#tpu.dimension_semantics<arbitrary>], iteration_bounds = array<i64: 2>, scalar_prefetch = 0 : i64, scratch_operands = 1 : i64, tpu.core_type = #tpu.core_type<tc>, window_params = [{pipeline_mode = #tpu.pipeline_mode<synchronous>, transform_indices = @transform_0, window_bounds = array<i64: 16, 32>}, {pipeline_mode = #tpu.pipeline_mode<synchronous>, transform_indices = @transform_1, window_bounds = array<i64: 2, 16>}, {pipeline_mode = #tpu.pipeline_mode<synchronous>, transform_indices = @transform_2, window_bounds = array<i64: 16, 1>}, {pipeline_mode = #tpu.pipeline_mode<synchronous>, transform_indices = @transform_3, window_bounds = array<i64: 2, 32>}, {transform_indices = @transform_4, window_bounds = array<i64: 1, 32, 96>}, {transform_indices = @transform_5, window_bounds = array<i64: 1, 32, 32>}, {transform_indices = @transform_6, window_bounds = array<i64: 1, 32, 128>}, {transform_indices = @transform_7, window_bounds = array<i64: 1, 128, 32>}, {transform_indices = @transform_8, window_bounds = array<i64: 1, 8, 128>}, {pipeline_mode = #tpu.pipeline_mode<synchronous>, transform_indices = @transform_9, window_bounds = array<i64: 32, 128>}, {pipeline_mode = #tpu.pipeline_mode<synchronous>, transform_indices = @transform_10, window_bounds = array<i64: 1, 128>}, {pipeline_mode = #tpu.pipeline_mode<synchronous>, transform_indices = @transform_11, window_bounds = array<i64: 16, 1>}, {pipeline_mode = #tpu.pipeline_mode<synchronous>, transform_indices = @transform_12, window_bounds = array<i64: 16, 128>}, {pipeline_mode = #tpu.pipeline_mode<synchronous>, transform_indices = @transform_13, window_bounds = array<i64: 1, 1>}]} {
    %c0_i32 = arith.constant 0 : i32
    %0 = arith.cmpi eq, %arg0, %c0_i32 : i32
    %1 = arith.extui %0 : i1 to i32
    %c0_i32_0 = arith.constant 0 : i32
    %2 = arith.cmpi ne, %1, %c0_i32_0 : i32
    scf.if %2 {
      %c0_54 = arith.constant 0 : index
      %c0_55 = arith.constant 0 : index
      %160 = vector.load %arg4[%c0_54, %c0_55] : memref<2x32xf32, #tpu.memory_space<vmem>>, vector<2x32xf32>
      %c0_56 = arith.constant 0 : index
      %c0_57 = arith.constant 0 : index
      %161 = vector.load %arg1[%c0_56, %c0_57] : memref<16x32xf32, #tpu.memory_space<vmem>>, vector<16x32xf32>
      %162 = vector.extract_strided_slice %160 {offsets = [0, 0], sizes = [1, 32], strides = [1, 1]} : vector<2x32xf32> to vector<1x32xf32>
      %163 = vector.extract_strided_slice %160 {offsets = [1, 0], sizes = [1, 32], strides = [1, 1]} : vector<2x32xf32> to vector<1x32xf32>
      %cst_58 = arith.constant dense<0.000000e+00> : vector<16xf32>
      %164 = vector.multi_reduction <add>, %161, %cst_58 [1] : vector<16x32xf32> to vector<16xf32>
      %165 = vector.shape_cast %164 : vector<16xf32> to vector<16x1xf32>
      %cst_59 = arith.constant 3.200000e+01 : f32
      %166 = vector.broadcast %cst_59 : f32 to vector<16x1xf32>
      %167 = arith.divf %165, %166 : vector<16x1xf32>
      %168 = vector.broadcast %167 : vector<16x1xf32> to vector<16x32xf32>
      %169 = arith.subf %161, %168 : vector<16x32xf32>
      %170 = arith.mulf %169, %169 : vector<16x32xf32>
      %cst_60 = arith.constant dense<0.000000e+00> : vector<16xf32>
      %171 = vector.multi_reduction <add>, %170, %cst_60 [1] : vector<16x32xf32> to vector<16xf32>
      %172 = vector.shape_cast %171 : vector<16xf32> to vector<16x1xf32>
      %cst_61 = arith.constant 3.200000e+01 : f32
      %173 = vector.broadcast %cst_61 : f32 to vector<16x1xf32>
      %174 = arith.divf %172, %173 : vector<16x1xf32>
      %175 = vector.broadcast %167 : vector<16x1xf32> to vector<16x32xf32>
      %176 = arith.subf %161, %175 : vector<16x32xf32>
      %cst_62 = arith.constant 9.99999996E-13 : f32
      %177 = vector.broadcast %cst_62 : f32 to vector<16x1xf32>
      %178 = arith.addf %174, %177 : vector<16x1xf32>
      %179 = math.rsqrt %178 : vector<16x1xf32>
      %180 = vector.broadcast %179 : vector<16x1xf32> to vector<16x32xf32>
      %181 = arith.mulf %176, %180 : vector<16x32xf32>
      %182 = vector.broadcast %162 : vector<1x32xf32> to vector<16x32xf32>
      %183 = arith.mulf %181, %182 : vector<16x32xf32>
      %184 = vector.broadcast %163 : vector<1x32xf32> to vector<16x32xf32>
      %185 = arith.addf %183, %184 : vector<16x32xf32>
      %c0_63 = arith.constant 0 : index
      %c0_64 = arith.constant 0 : index
      %186 = vector.load %arg15[%c0_63, %c0_64] : memref<16x32xf32, #tpu.memory_space<vmem>>, vector<16x32xf32>
      tpu.vector_store %arg15[%c0_63, %c0_64], %185 {strides = array<i32>} : memref<16x32xf32, #tpu.memory_space<vmem>>, vector<16x32xf32>,
    } else {
    }
    %c0 = arith.constant 0 : index
    %c0_1 = arith.constant 0 : index
    %3 = vector.load %arg15[%c0, %c0_1] : memref<16x32xf32, #tpu.memory_space<vmem>>, vector<16x32xf32>
    %c0_2 = arith.constant 0 : index
    %c0_3 = arith.constant 0 : index
    %c0_4 = arith.constant 0 : index
    %4 = vector.load %arg9[%c0_2, %c0_3, %c0_4] : memref<1x8x128xf32, #tpu.memory_space<vmem>>, vector<1x8x128xf32>
    %5 = vector.shape_cast %4 : vector<1x8x128xf32> to vector<8x128xf32>
    %6 = vector.extract_strided_slice %5 {offsets = [0, 0], sizes = [1, 96], strides = [1, 1]} : vector<8x128xf32> to vector<1x96xf32>
    %7 = vector.extract_strided_slice %5 {offsets = [1, 0], sizes = [1, 32], strides = [1, 1]} : vector<8x128xf32> to vector<1x32xf32>
    %8 = vector.extract_strided_slice %5 {offsets = [2, 0], sizes = [1, 32], strides = [1, 1]} : vector<8x128xf32> to vector<1x32xf32>
    %9 = vector.extract_strided_slice %5 {offsets = [3, 0], sizes = [1, 32], strides = [1, 1]} : vector<8x128xf32> to vector<1x32xf32>
    %10 = vector.extract_strided_slice %5 {offsets = [4, 0], sizes = [1, 128], strides = [1, 1]} : vector<8x128xf32> to vector<1x128xf32>
    %11 = vector.extract_strided_slice %5 {offsets = [5, 0], sizes = [1, 32], strides = [1, 1]} : vector<8x128xf32> to vector<1x32xf32>
    %12 = vector.extract_strided_slice %5 {offsets = [6, 0], sizes = [1, 32], strides = [1, 1]} : vector<8x128xf32> to vector<1x32xf32>
    %13 = vector.extract_strided_slice %5 {offsets = [7, 0], sizes = [1, 32], strides = [1, 1]} : vector<8x128xf32> to vector<1x32xf32>
    %c0_5 = arith.constant 0 : index
    %c0_6 = arith.constant 0 : index
    %14 = vector.load %arg2[%c0_5, %c0_6] : memref<2x16xf32, #tpu.memory_space<vmem>>, vector<2x16xf32>
    %15 = vector.extract_strided_slice %14 {offsets = [0, 0], sizes = [1, 16], strides = [1, 1]} : vector<2x16xf32> to vector<1x16xf32>
    %16 = vector.extract_strided_slice %14 {offsets = [1, 0], sizes = [1, 16], strides = [1, 1]} : vector<2x16xf32> to vector<1x16xf32>
    %cst = arith.constant 5.000000e-01 : f32
    %17 = vector.broadcast %cst : f32 to vector<1x16xf32>
    %18 = arith.cmpf ogt, %16, %17 : vector<1x16xf32>
    %c0_7 = arith.constant 0 : index
    %c0_8 = arith.constant 0 : index
    %19 = vector.load %arg3[%c0_7, %c0_8] : memref<16x1xf32, #tpu.memory_space<vmem>>, vector<16x1xf32>
    %20 = vector.broadcast %19 : vector<16x1xf32> to vector<16x16xf32>
    %21 = vector.broadcast %15 : vector<1x16xf32> to vector<16x16xf32>
    %22 = arith.cmpf oeq, %20, %21 : vector<16x16xf32>
    %23 = vector.broadcast %18 : vector<1x16xi1> to vector<16x16xi1>
    %24 = arith.andi %22, %23 : vector<16x16xi1>
    %cst_9 = arith.constant 0.000000e+00 : f32
    %cst_10 = arith.constant -1.000000e+09 : f32
    %25 = vector.broadcast %cst_9 : f32 to vector<16x16xf32>
    %26 = vector.broadcast %cst_10 : f32 to vector<16x16xf32>
    %27 = arith.select %24, %25, %26 : vector<16x16xi1>, vector<16x16xf32>
    %28 = arith.truncf %3 : vector<16x32xf32> to vector<16x32xbf16>
    %c0_11 = arith.constant 0 : index
    %c0_12 = arith.constant 0 : index
    %c0_13 = arith.constant 0 : index
    %29 = vector.load %arg5[%c0_11, %c0_12, %c0_13] : memref<1x32x96xbf16, #tpu.memory_space<vmem>>, vector<1x32x96xbf16>
    %30 = vector.shape_cast %29 : vector<1x32x96xbf16> to vector<32x96xbf16>
    %cst_14 = arith.constant dense<0.000000e+00> : vector<16x96xf32>
    %31 = tpu.matmul %28, %30, %cst_14 {dimension_numbers = #tpu.dot_dimension_numbers<[1], [0], [0], [1], [0, 0, 1, 1], [], []>} : vector<16x32xbf16>, vector<32x96xbf16>, vector<16x96xf32> -> vector<16x96xf32>
    %32 = vector.broadcast %6 : vector<1x96xf32> to vector<16x96xf32>
    %33 = arith.addf %31, %32 : vector<16x96xf32>
    %34 = vector.extract_strided_slice %33 {offsets = [0, 0], sizes = [16, 16], strides = [1, 1]} : vector<16x96xf32> to vector<16x16xf32>
    %35 = arith.truncf %34 : vector<16x16xf32> to vector<16x16xbf16>
    %36 = vector.extract_strided_slice %33 {offsets = [0, 32], sizes = [16, 16], strides = [1, 1]} : vector<16x96xf32> to vector<16x16xf32>
    %37 = arith.truncf %36 : vector<16x16xf32> to vector<16x16xbf16>
    %38 = vector.extract_strided_slice %33 {offsets = [0, 64], sizes = [16, 16], strides = [1, 1]} : vector<16x96xf32> to vector<16x16xf32>
    %39 = arith.truncf %38 : vector<16x16xf32> to vector<16x16xbf16>
    %cst_15 = arith.constant dense<0.000000e+00> : vector<16x16xf32>
    %40 = tpu.matmul %35, %37, %cst_15 {dimension_numbers = #tpu.dot_dimension_numbers<[1], [1], [0], [0], [0, 0, 1, 0], [], []>} : vector<16x16xbf16>, vector<16x16xbf16>, vector<16x16xf32> -> vector<16x16xf32>
    %cst_16 = arith.constant 2.500000e-01 : f32
    %41 = vector.broadcast %cst_16 : f32 to vector<16x16xf32>
    %42 = arith.mulf %40, %41 : vector<16x16xf32>
    %43 = arith.addf %42, %27 : vector<16x16xf32>
    %cst_17 = arith.constant dense<0xFF800000> : vector<16xf32>
    %44 = vector.multi_reduction <maximumf>, %43, %cst_17 [1] : vector<16x16xf32> to vector<16xf32>
    %45 = vector.shape_cast %44 : vector<16xf32> to vector<16x1xf32>
    %46 = vector.broadcast %45 : vector<16x1xf32> to vector<16x16xf32>
    %47 = arith.subf %43, %46 : vector<16x16xf32>
    %48 = math.exp %47 : vector<16x16xf32>
    %cst_18 = arith.constant dense<0.000000e+00> : vector<16xf32>
    %49 = vector.multi_reduction <add>, %48, %cst_18 [1] : vector<16x16xf32> to vector<16xf32>
    %50 = vector.shape_cast %49 : vector<16xf32> to vector<16x1xf32>
    %51 = tpu.reciprocal %50 {approx = true} : vector<16x1xf32> -> vector<16x1xf32>
    %52 = vector.broadcast %51 : vector<16x1xf32> to vector<16x16xf32>
    %53 = arith.mulf %48, %52 : vector<16x16xf32>
    %54 = arith.truncf %53 : vector<16x16xf32> to vector<16x16xbf16>
    %cst_19 = arith.constant dense<0.000000e+00> : vector<16x16xf32>
    %55 = tpu.matmul %54, %39, %cst_19 {dimension_numbers = #tpu.dot_dimension_numbers<[1], [0], [0], [1], [0, 0, 1, 1], [], []>} : vector<16x16xbf16>, vector<16x16xbf16>, vector<16x16xf32> -> vector<16x16xf32>
    %56 = vector.extract_strided_slice %33 {offsets = [0, 16], sizes = [16, 16], strides = [1, 1]} : vector<16x96xf32> to vector<16x16xf32>
    %57 = arith.truncf %56 : vector<16x16xf32> to vector<16x16xbf16>
    %58 = vector.extract_strided_slice %33 {offsets = [0, 48], sizes = [16, 16], strides = [1, 1]} : vector<16x96xf32> to vector<16x16xf32>
    %59 = arith.truncf %58 : vector<16x16xf32> to vector<16x16xbf16>
    %60 = vector.extract_strided_slice %33 {offsets = [0, 80], sizes = [16, 16], strides = [1, 1]} : vector<16x96xf32> to vector<16x16xf32>
    %61 = arith.truncf %60 : vector<16x16xf32> to vector<16x16xbf16>
    %cst_20 = arith.constant dense<0.000000e+00> : vector<16x16xf32>
    %62 = tpu.matmul %57, %59, %cst_20 {dimension_numbers = #tpu.dot_dimension_numbers<[1], [1], [0], [0], [0, 0, 1, 0], [], []>} : vector<16x16xbf16>, vector<16x16xbf16>, vector<16x16xf32> -> vector<16x16xf32>
    %cst_21 = arith.constant 2.500000e-01 : f32
    %63 = vector.broadcast %cst_21 : f32 to vector<16x16xf32>
    %64 = arith.mulf %62, %63 : vector<16x16xf32>
    %65 = arith.addf %64, %27 : vector<16x16xf32>
    %cst_22 = arith.constant dense<0xFF800000> : vector<16xf32>
    %66 = vector.multi_reduction <maximumf>, %65, %cst_22 [1] : vector<16x16xf32> to vector<16xf32>
    %67 = vector.shape_cast %66 : vector<16xf32> to vector<16x1xf32>
    %68 = vector.broadcast %67 : vector<16x1xf32> to vector<16x16xf32>
    %69 = arith.subf %65, %68 : vector<16x16xf32>
    %70 = math.exp %69 : vector<16x16xf32>
    %cst_23 = arith.constant dense<0.000000e+00> : vector<16xf32>
    %71 = vector.multi_reduction <add>, %70, %cst_23 [1] : vector<16x16xf32> to vector<16xf32>
    %72 = vector.shape_cast %71 : vector<16xf32> to vector<16x1xf32>
    %73 = tpu.reciprocal %72 {approx = true} : vector<16x1xf32> -> vector<16x1xf32>
    %74 = vector.broadcast %73 : vector<16x1xf32> to vector<16x16xf32>
    %75 = arith.mulf %70, %74 : vector<16x16xf32>
    %76 = arith.truncf %75 : vector<16x16xf32> to vector<16x16xbf16>
    %cst_24 = arith.constant dense<0.000000e+00> : vector<16x16xf32>
    %77 = tpu.matmul %76, %61, %cst_24 {dimension_numbers = #tpu.dot_dimension_numbers<[1], [0], [0], [1], [0, 0, 1, 1], [], []>} : vector<16x16xbf16>, vector<16x16xbf16>, vector<16x16xf32> -> vector<16x16xf32>
    %78 = tpu.concatenate %55, %77 in 1 : vector<16x16xf32>, vector<16x16xf32> -> vector<16x32xf32>
    %79 = arith.truncf %78 : vector<16x32xf32> to vector<16x32xbf16>
    %c0_25 = arith.constant 0 : index
    %c0_26 = arith.constant 0 : index
    %c0_27 = arith.constant 0 : index
    %80 = vector.load %arg6[%c0_25, %c0_26, %c0_27] : memref<1x32x32xbf16, #tpu.memory_space<vmem>>, vector<1x32x32xbf16>
    %81 = vector.shape_cast %80 : vector<1x32x32xbf16> to vector<32x32xbf16>
    %cst_28 = arith.constant dense<0.000000e+00> : vector<16x32xf32>
    %82 = tpu.matmul %79, %81, %cst_28 {dimension_numbers = #tpu.dot_dimension_numbers<[1], [0], [0], [1], [0, 0, 1, 1], [], []>} : vector<16x32xbf16>, vector<32x32xbf16>, vector<16x32xf32> -> vector<16x32xf32>
    %83 = vector.broadcast %7 : vector<1x32xf32> to vector<16x32xf32>
    %84 = arith.addf %82, %83 : vector<16x32xf32>
    %85 = arith.addf %84, %3 : vector<16x32xf32>
    %cst_29 = arith.constant dense<0.000000e+00> : vector<16xf32>
    %86 = vector.multi_reduction <add>, %85, %cst_29 [1] : vector<16x32xf32> to vector<16xf32>
    %87 = vector.shape_cast %86 : vector<16xf32> to vector<16x1xf32>
    %cst_30 = arith.constant 3.200000e+01 : f32
    %88 = vector.broadcast %cst_30 : f32 to vector<16x1xf32>
    %89 = arith.divf %87, %88 : vector<16x1xf32>
    %90 = vector.broadcast %89 : vector<16x1xf32> to vector<16x32xf32>
    %91 = arith.subf %85, %90 : vector<16x32xf32>
    %92 = arith.mulf %91, %91 : vector<16x32xf32>
    %cst_31 = arith.constant dense<0.000000e+00> : vector<16xf32>
    %93 = vector.multi_reduction <add>, %92, %cst_31 [1] : vector<16x32xf32> to vector<16xf32>
    %94 = vector.shape_cast %93 : vector<16xf32> to vector<16x1xf32>
    %cst_32 = arith.constant 3.200000e+01 : f32
    %95 = vector.broadcast %cst_32 : f32 to vector<16x1xf32>
    %96 = arith.divf %94, %95 : vector<16x1xf32>
    %97 = vector.broadcast %89 : vector<16x1xf32> to vector<16x32xf32>
    %98 = arith.subf %85, %97 : vector<16x32xf32>
    %cst_33 = arith.constant 9.99999996E-13 : f32
    %99 = vector.broadcast %cst_33 : f32 to vector<16x1xf32>
    %100 = arith.addf %96, %99 : vector<16x1xf32>
    %101 = math.rsqrt %100 : vector<16x1xf32>
    %102 = vector.broadcast %101 : vector<16x1xf32> to vector<16x32xf32>
    %103 = arith.mulf %98, %102 : vector<16x32xf32>
    %104 = vector.broadcast %8 : vector<1x32xf32> to vector<16x32xf32>
    %105 = arith.mulf %103, %104 : vector<16x32xf32>
    %106 = vector.broadcast %9 : vector<1x32xf32> to vector<16x32xf32>
    %107 = arith.addf %105, %106 : vector<16x32xf32>
    %108 = arith.truncf %107 : vector<16x32xf32> to vector<16x32xbf16>
    %c0_34 = arith.constant 0 : index
    %c0_35 = arith.constant 0 : index
    %c0_36 = arith.constant 0 : index
    %109 = vector.load %arg7[%c0_34, %c0_35, %c0_36] : memref<1x32x128xbf16, #tpu.memory_space<vmem>>, vector<1x32x128xbf16>
    %110 = vector.shape_cast %109 : vector<1x32x128xbf16> to vector<32x128xbf16>
    %cst_37 = arith.constant dense<0.000000e+00> : vector<16x128xf32>
    %111 = tpu.matmul %108, %110, %cst_37 {dimension_numbers = #tpu.dot_dimension_numbers<[1], [0], [0], [1], [0, 0, 1, 1], [], []>} : vector<16x32xbf16>, vector<32x128xbf16>, vector<16x128xf32> -> vector<16x128xf32>
    %112 = vector.broadcast %10 : vector<1x128xf32> to vector<16x128xf32>
    %113 = arith.addf %111, %112 : vector<16x128xf32>
    %114 = arith.mulf %113, %113 : vector<16x128xf32>
    %115 = arith.mulf %113, %114 : vector<16x128xf32>
    %cst_38 = arith.constant 4.471500e-02 : f32
    %116 = vector.broadcast %cst_38 : f32 to vector<16x128xf32>
    %117 = arith.mulf %116, %115 : vector<16x128xf32>
    %118 = arith.addf %113, %117 : vector<16x128xf32>
    %cst_39 = arith.constant 0.797884583 : f32
    %119 = vector.broadcast %cst_39 : f32 to vector<16x128xf32>
    %120 = arith.mulf %119, %118 : vector<16x128xf32>
    %121 = math.tanh %120 : vector<16x128xf32>
    %cst_40 = arith.constant 1.000000e+00 : f32
    %122 = vector.broadcast %cst_40 : f32 to vector<16x128xf32>
    %123 = arith.addf %122, %121 : vector<16x128xf32>
    %cst_41 = arith.constant 5.000000e-01 : f32
    %124 = vector.broadcast %cst_41 : f32 to vector<16x128xf32>
    %125 = arith.mulf %124, %123 : vector<16x128xf32>
    %126 = arith.mulf %113, %125 : vector<16x128xf32>
    %127 = arith.truncf %126 : vector<16x128xf32> to vector<16x128xbf16>
    %c0_42 = arith.constant 0 : index
    %c0_43 = arith.constant 0 : index
    %c0_44 = arith.constant 0 : index
    %128 = vector.load %arg8[%c0_42, %c0_43, %c0_44] : memref<1x128x32xbf16, #tpu.memory_space<vmem>>, vector<1x128x32xbf16>
    %129 = vector.shape_cast %128 : vector<1x128x32xbf16> to vector<128x32xbf16>
    %cst_45 = arith.constant dense<0.000000e+00> : vector<16x32xf32>
    %130 = tpu.matmul %127, %129, %cst_45 {dimension_numbers = #tpu.dot_dimension_numbers<[1], [0], [0], [1], [0, 0, 1, 1], [], []>} : vector<16x128xbf16>, vector<128x32xbf16>, vector<16x32xf32> -> vector<16x32xf32>
    %131 = vector.broadcast %11 : vector<1x32xf32> to vector<16x32xf32>
    %132 = arith.addf %130, %131 : vector<16x32xf32>
    %133 = arith.addf %132, %107 : vector<16x32xf32>
    %cst_46 = arith.constant dense<0.000000e+00> : vector<16xf32>
    %134 = vector.multi_reduction <add>, %133, %cst_46 [1] : vector<16x32xf32> to vector<16xf32>
    %135 = vector.shape_cast %134 : vector<16xf32> to vector<16x1xf32>
    %cst_47 = arith.constant 3.200000e+01 : f32
    %136 = vector.broadcast %cst_47 : f32 to vector<16x1xf32>
    %137 = arith.divf %135, %136 : vector<16x1xf32>
    %138 = vector.broadcast %137 : vector<16x1xf32> to vector<16x32xf32>
    %139 = arith.subf %133, %138 : vector<16x32xf32>
    %140 = arith.mulf %139, %139 : vector<16x32xf32>
    %cst_48 = arith.constant dense<0.000000e+00> : vector<16xf32>
    %141 = vector.multi_reduction <add>, %140, %cst_48 [1] : vector<16x32xf32> to vector<16xf32>
    %142 = vector.shape_cast %141 : vector<16xf32> to vector<16x1xf32>
    %cst_49 = arith.constant 3.200000e+01 : f32
    %143 = vector.broadcast %cst_49 : f32 to vector<16x1xf32>
    %144 = arith.divf %142, %143 : vector<16x1xf32>
    %145 = vector.broadcast %137 : vector<16x1xf32> to vector<16x32xf32>
    %146 = arith.subf %133, %145 : vector<16x32xf32>
    %cst_50 = arith.constant 9.99999996E-13 : f32
    %147 = vector.broadcast %cst_50 : f32 to vector<16x1xf32>
    %148 = arith.addf %144, %147 : vector<16x1xf32>
    %149 = math.rsqrt %148 : vector<16x1xf32>
    %150 = vector.broadcast %149 : vector<16x1xf32> to vector<16x32xf32>
    %151 = arith.mulf %146, %150 : vector<16x32xf32>
    %152 = vector.broadcast %12 : vector<1x32xf32> to vector<16x32xf32>
    %153 = arith.mulf %151, %152 : vector<16x32xf32>
    %154 = vector.broadcast %13 : vector<1x32xf32> to vector<16x32xf32>
    %155 = arith.addf %153, %154 : vector<16x32xf32>
    %c0_51 = arith.constant 0 : index
    %c0_52 = arith.constant 0 : index
    %156 = vector.load %arg15[%c0_51, %c0_52] : memref<16x32xf32, #tpu.memory_space<vmem>>, vector<16x32xf32>
    tpu.vector_store %arg15[%c0_51, %c0_52], %155 {strides = array<i32>} : memref<16x32xf32, #tpu.memory_space<vmem>>, vector<16x32xf32>,
    %c1_i32 = arith.constant 1 : i32
    %157 = arith.cmpi eq, %arg0, %c1_i32 : i32
    %158 = arith.extui %157 : i1 to i32
    %c0_i32_53 = arith.constant 0 : i32
    %159 = arith.cmpi ne, %158, %c0_i32_53 : i32
    scf.if %159 {
      %160 = arith.truncf %155 : vector<16x32xf32> to vector<16x32xbf16>
      %c0_54 = arith.constant 0 : index
      %c0_55 = arith.constant 0 : index
      %161 = vector.load %arg10[%c0_54, %c0_55] : memref<32x128xbf16, #tpu.memory_space<vmem>>, vector<32x128xbf16>
      %cst_56 = arith.constant dense<0.000000e+00> : vector<16x128xf32>
      %162 = tpu.matmul %160, %161, %cst_56 {dimension_numbers = #tpu.dot_dimension_numbers<[1], [0], [0], [1], [0, 0, 1, 1], [], []>} : vector<16x32xbf16>, vector<32x128xbf16>, vector<16x128xf32> -> vector<16x128xf32>
      %c0_57 = arith.constant 0 : index
      %c0_58 = arith.constant 0 : index
      %163 = vector.load %arg11[%c0_57, %c0_58] : memref<1x128xf32, #tpu.memory_space<vmem>>, vector<1x128xf32>
      %164 = vector.broadcast %163 : vector<1x128xf32> to vector<16x128xf32>
      %165 = arith.addf %162, %164 : vector<16x128xf32>
      %c0_59 = arith.constant 0 : index
      %c0_60 = arith.constant 0 : index
      %166 = vector.load %arg13[%c0_59, %c0_60] : memref<16x128xf32, #tpu.memory_space<vmem>>, vector<16x128xf32>
      tpu.vector_store %arg13[%c0_59, %c0_60], %165 {strides = array<i32>} : memref<16x128xf32, #tpu.memory_space<vmem>>, vector<16x128xf32>,
      %167 = tpu.iota {dimensions = array<i32: 1>} : vector<16x128xi32>
      %c5_i32 = arith.constant 5 : i32
      %168 = vector.broadcast %c5_i32 : i32 to vector<16x128xi32>
      %169 = arith.cmpi slt, %167, %168 : vector<16x128xi32>
      %cst_61 = arith.constant -1.000000e+09 : f32
      %170 = vector.broadcast %cst_61 : f32 to vector<16x128xf32>
      %171 = arith.select %169, %165, %170 : vector<16x128xi1>, vector<16x128xf32>
      %cst_62 = arith.constant dense<0xFF800000> : vector<16xf32>
      %172 = vector.multi_reduction <maximumf>, %171, %cst_62 [1] : vector<16x128xf32> to vector<16xf32>
      %173 = vector.shape_cast %172 : vector<16xf32> to vector<16x1xf32>
      %174 = vector.broadcast %173 : vector<16x1xf32> to vector<16x128xf32>
      %175 = arith.subf %171, %174 : vector<16x128xf32>
      %176 = math.exp %175 : vector<16x128xf32>
      %cst_63 = arith.constant dense<0.000000e+00> : vector<16xf32>
      %177 = vector.multi_reduction <add>, %176, %cst_63 [1] : vector<16x128xf32> to vector<16xf32>
      %178 = vector.shape_cast %177 : vector<16xf32> to vector<16x1xf32>
      %179 = math.log %178 : vector<16x1xf32>
      %180 = arith.addf %179, %173 : vector<16x1xf32>
      %c0_64 = arith.constant 0 : index
      %c0_65 = arith.constant 0 : index
      %181 = vector.load %arg12[%c0_64, %c0_65] : memref<16x1xi32, #tpu.memory_space<vmem>>, vector<16x1xi32>
      %182 = vector.broadcast %181 : vector<16x1xi32> to vector<16x128xi32>
      %183 = arith.cmpi eq, %167, %182 : vector<16x128xi32>
      %cst_66 = arith.constant 0.000000e+00 : f32
      %184 = vector.broadcast %cst_66 : f32 to vector<16x128xf32>
      %185 = arith.select %183, %171, %184 : vector<16x128xi1>, vector<16x128xf32>
      %cst_67 = arith.constant dense<0.000000e+00> : vector<16xf32>
      %186 = vector.multi_reduction <add>, %185, %cst_67 [1] : vector<16x128xf32> to vector<16xf32>
      %187 = vector.shape_cast %186 : vector<16xf32> to vector<16x1xf32>
      %c-100_i32 = arith.constant -100 : i32
      %188 = vector.broadcast %c-100_i32 : i32 to vector<16x1xi32>
      %189 = arith.cmpi ne, %181, %188 : vector<16x1xi32>
      %190 = arith.subf %180, %187 : vector<16x1xf32>
      %cst_68 = arith.constant 0.000000e+00 : f32
      %191 = vector.broadcast %cst_68 : f32 to vector<16x1xf32>
      %192 = arith.select %189, %190, %191 : vector<16x1xi1>, vector<16x1xf32>
      %cst_69 = arith.constant dense<0.000000e+00> : vector<1xf32>
      %193 = vector.multi_reduction <add>, %192, %cst_69 [0] : vector<16x1xf32> to vector<1xf32>
      %194 = vector.shape_cast %193 : vector<1xf32> to vector<1x1xf32>
      %195 = arith.extui %189 : vector<16x1xi1> to vector<16x1xi32>
      %196 = arith.sitofp %195 : vector<16x1xi32> to vector<16x1xf32>
      %cst_70 = arith.constant dense<0.000000e+00> : vector<1xf32>
      %197 = vector.multi_reduction <add>, %196, %cst_70 [0] : vector<16x1xf32> to vector<1xf32>
      %198 = vector.shape_cast %197 : vector<1xf32> to vector<1x1xf32>
      %cst_71 = arith.constant 1.000000e+00 : f32
      %199 = vector.broadcast %cst_71 : f32 to vector<1x1xf32>
      %200 = arith.maximumf %198, %199 : vector<1x1xf32>
      %201 = arith.divf %194, %200 : vector<1x1xf32>
      %c0_72 = arith.constant 0 : index
      %c0_73 = arith.constant 0 : index
      %202 = vector.load %arg14[%c0_72, %c0_73] : memref<1x1xf32, #tpu.memory_space<vmem>>, vector<1x1xf32>
      tpu.vector_store %arg14[%c0_72, %c0_73], %201 {strides = array<i32>} : memref<1x1xf32, #tpu.memory_space<vmem>>, vector<1x1xf32>,
    } else {
    }
    return
  }
  func.func @transform_0(%arg0: i32) -> (i32, i32) {
    %c0_i32 = arith.constant 0 : i32
    %c0_i32_0 = arith.constant 0 : i32
    %c0_i32_1 = arith.constant 0 : i32
    return %c0_i32, %c0_i32_0 : i32, i32
  }
  func.func @transform_1(%arg0: i32) -> (i32, i32) {
    %c0_i32 = arith.constant 0 : i32
    %c0_i32_0 = arith.constant 0 : i32
    %c0_i32_1 = arith.constant 0 : i32
    return %c0_i32, %c0_i32_0 : i32, i32
  }
  func.func @transform_2(%arg0: i32) -> (i32, i32) {
    %c0_i32 = arith.constant 0 : i32
    %c0_i32_0 = arith.constant 0 : i32
    %c0_i32_1 = arith.constant 0 : i32
    return %c0_i32, %c0_i32_0 : i32, i32
  }
  func.func @transform_3(%arg0: i32) -> (i32, i32) {
    %c0_i32 = arith.constant 0 : i32
    %c0_i32_0 = arith.constant 0 : i32
    %c0_i32_1 = arith.constant 0 : i32
    return %c0_i32, %c0_i32_0 : i32, i32
  }
  func.func @transform_4(%arg0: i32) -> (i32, i32, i32) {
    %c0_i32 = arith.constant 0 : i32
    %c0_i32_0 = arith.constant 0 : i32
    %c0_i32_1 = arith.constant 0 : i32
    return %arg0, %c0_i32, %c0_i32_0 : i32, i32, i32
  }
  func.func @transform_5(%arg0: i32) -> (i32, i32, i32) {
    %c0_i32 = arith.constant 0 : i32
    %c0_i32_0 = arith.constant 0 : i32
    %c0_i32_1 = arith.constant 0 : i32
    return %arg0, %c0_i32, %c0_i32_0 : i32, i32, i32
  }
  func.func @transform_6(%arg0: i32) -> (i32, i32, i32) {
    %c0_i32 = arith.constant 0 : i32
    %c0_i32_0 = arith.constant 0 : i32
    %c0_i32_1 = arith.constant 0 : i32
    return %arg0, %c0_i32, %c0_i32_0 : i32, i32, i32
  }
  func.func @transform_7(%arg0: i32) -> (i32, i32, i32) {
    %c0_i32 = arith.constant 0 : i32
    %c0_i32_0 = arith.constant 0 : i32
    %c0_i32_1 = arith.constant 0 : i32
    return %arg0, %c0_i32, %c0_i32_0 : i32, i32, i32
  }
  func.func @transform_8(%arg0: i32) -> (i32, i32, i32) {
    %c0_i32 = arith.constant 0 : i32
    %c0_i32_0 = arith.constant 0 : i32
    %c0_i32_1 = arith.constant 0 : i32
    return %arg0, %c0_i32, %c0_i32_0 : i32, i32, i32
  }
  func.func @transform_9(%arg0: i32) -> (i32, i32) {
    %c0_i32 = arith.constant 0 : i32
    %c0_i32_0 = arith.constant 0 : i32
    %c0_i32_1 = arith.constant 0 : i32
    return %c0_i32, %c0_i32_0 : i32, i32
  }
  func.func @transform_10(%arg0: i32) -> (i32, i32) {
    %c0_i32 = arith.constant 0 : i32
    %c0_i32_0 = arith.constant 0 : i32
    %c0_i32_1 = arith.constant 0 : i32
    return %c0_i32, %c0_i32_0 : i32, i32
  }
  func.func @transform_11(%arg0: i32) -> (i32, i32) {
    %c0_i32 = arith.constant 0 : i32
    %c0_i32_0 = arith.constant 0 : i32
    %c0_i32_1 = arith.constant 0 : i32
    return %c0_i32, %c0_i32_0 : i32, i32
  }
  func.func @transform_12(%arg0: i32) -> (i32, i32) {
    %c0_i32 = arith.constant 0 : i32
    %c0_i32_0 = arith.constant 0 : i32
    %c0_i32_1 = arith.constant 0 : i32
    return %c0_i32, %c0_i32_0 : i32, i32
  }
  func.func @transform_13(%arg0: i32) -> (i32, i32) {
    %c0_i32 = arith.constant 0 : i32
    %c0_i32_0 = arith.constant 0 : i32
    %c0_i32_1 = arith.constant 0 : i32
    return %c0_i32, %c0_i32_0 : i32, i32
  }
}

</mosaic_0001>

<bundles_post_ra>
// kernel: bert_forward.1
= control target key start
LH: loop header
LB: loop body
LE: loop exit
PB: predicated region body
PF: predicated region fallthrough
CT: control target
= control target key end

     0   :  { %s2116_s0 = inlined_call_operand.vmem [shape: f32[16,32], index: 0, kind: input, shape index: {}]   ;;  %s2117_s1 = inlined_call_operand.vmem [shape: f32[2,16], index: 1, kind: input, shape index: {}]   ;;  %s2118_s2 = inlined_call_operand.vmem [shape: f32[16,1], index: 2, kind: input, shape index: {}]   ;;  %s2119_s3 = inlined_call_operand.vmem [shape: f32[2,32], index: 3, kind: input, shape index: {}]   ;;  %s2120_s4 = inlined_call_operand.vmem [shape: bf16[2,32,96], index: 4, kind: input, shape index: {}]   ;;  %s2121_s5 = inlined_call_operand.vmem [shape: bf16[2,32,32], index: 5, kind: input, shape index: {}]   ;;  %s2122_s6 = inlined_call_operand.vmem [shape: bf16[2,32,128], index: 6, kind: input, shape index: {}]   ;;  %s2123_s7 = inlined_call_operand.vmem [shape: bf16[2,128,32], index: 7, kind: input, shape index: {}]   ;;  %s2124_s8 = inlined_call_operand.vmem [shape: f32[2,8,128], index: 8, kind: input, shape index: {}]   ;;  %s2125_s9 = inlined_call_operand.vmem [shape: bf16[32,128], index: 9, kind: input, shape index: {}]   ;;  %s2126_s10 = inlined_call_operand.vmem [shape: f32[1,128], index: 10, kind: input, shape index: {}]   ;;  %s2127_s11 = inlined_call_operand.vmem [shape: s32[16,1], index: 11, kind: input, shape index: {}]   ;;  %s2128_s12 = inlined_call_operand.vmem [shape: f32[16,128], index: 12, kind: output, shape index: {0}]   ;;  %s2129_s13 = inlined_call_operand.hbm [shape: f32[1,1], index: 13, kind: output, shape index: {1}]  }
   0x1   :  { %2131 = sst [smem:[#allocation7_spill]] %s2129_s13 }
   0x2   :  { %19 = vsyncpa [#allocation4], 0  ;;  %s1872_s25 = smov 0  }
   0x3 LB: > { %2132 = sst [smem:[#allocation6_spill]] %s1786_s25  ;;  %s1878_s26 = sadd.s32 4294967295, %s1786_s25   ;;  %s1786_s25 = sphi %s1872_s25, %s25_s25  }
   0x4   : > { %p1505_p0 = scmp.ge.s32.totalorder %s1786_s25, 1  ;;  %p420_p1 = scmp.lt.s32.totalorder %s1786_s25, 3 }
   0x6   : > { %p421_p2 = pnand %p1505_p0, %p420_p1 }
   0x7   : > { %p478_p3 = scmp.lt.s32.totalorder (!%p421_p2), %s1878_s26, 1  ;;  %p1515_p4 = scmp.ne.s32.totalorder (!%p421_p2), %s1878_s26, 0 }
   0x8   : > { %424 = sbr.rel (%p421_p2) target bundleno = 3328 (0xd00), region = 68 }
   0xd   : > { %s479_s27 = scalar_select %p478_p3, %s1878_s26, 1 }
   0xf   : > { %s1548_s28 = sshll.u32 %s479_s27, 4  ;;  %s1551_s29 = sshll.u32 %s479_s27, 6 }
  0x10   : > { %s1887_s15 = scalar_lea.vmem %s2120_s4, %s1548_s28  ;;  %s1892_s18 = scalar_lea.vmem %s2121_s5, %s1548_s28 }
  0x11   : > { %s1897_s21 = scalar_lea.vmem %s2122_s6, %s1548_s28  ;;  %s1902_s24 = scalar_lea.vmem %s2123_s7, %s1551_s29 }
  0x12   : > { %s1514_s25 = sshll.u32 %s479_s27, 3  ;;  %506 = sbr.rel (%p1515_p4) target bundleno = 337 (0x151), region = 72 }
  0x13   : > { %s1907_s14 = scalar_lea.vmem %s2124_s8, %s1514_s25 }
  0x17   : > { %v508_v0 = vld [vmem:[%s2116_s0] sm:$0xff]  ;;  %vm510_vm0 = vcmask 261120   ;;  %v509_v1 = vld [vmem:[%s2116_s0 + $0x8] sm:$0xff]  ;;  %v538_v18 = vlaneseq }
  0x18   : > { %v511_v2 = vsel %vm510_vm0, %v508_v0, 0.0  ;;  %v514_v3 = vsel %vm510_vm0, %v509_v1, 0.0  ;;  %v507_v23 = vld [vmem:[%s2119_s3] sm:$0x3] }
  0x19   : > { %512 = vadd.xlane.f32.xlu0 %v511_v2  ;;  %v539_v21 = vshrl.u32 %v538_v18, 7 }
  0x1b   : > { %v540_v22 = vsub.s32 0, %v539_v21  ;;  %v546_v24 = vsub.s32 1, %v539_v21 }
  0x1d   : > { %515 = vadd.xlane.f32.xlu0 %v514_v3  ;;  %v541_v25 = vrot.slane %v507_v23, %v540_v22  ;;  %v547_v28 = vrot.slane %v507_v23, %v546_v24 }
  0xa2   : > { %v513_v4 = vpop.xlane.xlu0 %512 }
  0xa3   : > { %v518_v5 = vmul.f32 0.03125, %v513_v4 }
  0xa5   : > { %v520_v6 = vsub.f32 %v508_v0, %v518_v5 }
  0xa6   : > { %v516_v7 = vpop.xlane.xlu0 %515 }
  0xa7   : > { %v519_v8 = vmul.f32 0.03125, %v516_v7  ;;  %v522_v9 = vmul.f32 %v520_v6, %v520_v6 }
  0xa9   : > { %v521_v10 = vsub.f32 %v509_v1, %v519_v8  ;;  %v524_v11 = vsel %vm510_vm0, %v522_v9, 0.0 }
  0xaa   : > { %525 = vadd.xlane.f32.xlu1 %v524_v11 }
  0xab   : > { %v523_v12 = vmul.f32 %v521_v10, %v521_v10 }
  0xad   : > { %v527_v13 = vsel %vm510_vm0, %v523_v12, 0.0 }
  0xae   : > { %528 = vadd.xlane.f32.xlu1 %v527_v13 }
 0x133   : > { %v526_v14 = vpop.xlane.xlu1 %525 }
 0x134   : > { %v530_v15 = vmul.f32 0.03125, %v526_v14 }
 0x136   : > { %v532_v16 = vadd.f32 1e-12, %v530_v15 }
 0x137   : > { %v529_v17 = vpop.xlane.xlu1 %528 }
 0x138   : > { %1685 = vrsqrt.f32 %v532_v16  ;;  %v531_v19 = vmul.f32 0.03125, %v529_v17 }
 0x13a   : > { %v533_v20 = vadd.f32 1e-12, %v531_v19 }
 0x13c   : > { %1687 = vrsqrt.f32 %v533_v20 }
 0x145   : > { %v1686_v26 = vpop.eup %1685 }
 0x146   : > { %v536_v27 = vmul.f32 %v1686_v26, %v520_v6 }
 0x148   : > { %v542_v29 = vmul.f32 %v541_v25, %v536_v27 }
 0x149   : > { %v1688_v30 = vpop.eup %1687 }
 0x14a   : > { %v548_v31 = vadd.f32 %v547_v28, %v542_v29  ;;  %v537_v32 = vmul.f32 %v1688_v30, %v521_v10 }
 0x14c   : > { %550 = vst.msk [vmem:[#allocation2] sm:$0xff] %vm510_vm0, %v548_v31  ;;  %v543_v33 = vmul.f32 %v541_v25, %v537_v32 }
 0x14e   : > { %v549_v34 = vadd.f32 %v547_v28, %v543_v33 }
 0x150   : > { %551 = vst.msk [vmem:[#allocation2 + $0x8] sm:$0xff] %vm510_vm0, %v549_v34 }
 0x151 PF: > { %v1696_v35 = vld [vmem:[%s1887_s15 + $0x8] sm:$0xff]   ;;  %v1788_v36 = vmov 0.0   ;;  %v1697_v37 = vld [vmem:[%s1887_s15] sm:$0xff]   ;;  %vm1789_vm1 = vmmov 0   ;;  %vm606_vm2 = vcmask 261120   ;;  %v569_v41 = vlaneseq  ;;  %s1790_s27 = smov 112  }
 0x152   : > { %1581 = vmatprep.subr.bf16.mxu0 %v1788_v36  ;;  %1601 = vmatprep.subr.bf16.mxu1 %v1788_v36  ;;  %v1949_v44 = vld [vmem:[%s1907_s14] sm:$0xff]  ;;  %s1791_s29 = smov 96   ;;  %v1792_v53 = vmov 0   ;;  %s1793_s22 = smov 80   ;;  %v558_v55 = vld [vmem:[%s2118_s2 + $0x8] sm:$0xff]  ;;  %vm655_vm3 = vcmask 130048  }
 0x153   : > { %1582 = vmatpush3.bf16.msra.mxu0 %v1696_v35  ;;  %1585 = vmatprep.mubr.msk.bf16.mxu0 %vm1789_vm1, %v1788_v36  ;;  %v1931_v38 = vld [vmem:[#allocation2] sm:$0xff]  ;;  %v1945_v42 = vshrl.u32 %v569_v41, 7  ;;  %v1794_v4 = vmov -1e+09   ;;  %s1795_s17 = smov 64   ;;  %s1796_s28 = smov 48  }
 0x154   : > { %1583 = vmatprep.subr.bf16.mxu0 %v1788_v36  ;;  %1603 = vmatprep.mubr.msk.bf16.mxu1 %vm1789_vm1, %v1788_v36  ;;  %v557_v54 = vld [vmem:[%s2118_s2] sm:$0xff]  ;;  %s1797_s19 = smov 16   ;;  %p1537_p5 = scmp.ne.s32.totalorder %s1878_s26, 1 }
 0x155   : > { %v571_v43 = vsub.s32 0, %v1945_v42  ;;  %1689 = vset.pattern.permute.xlu1 %v1792_v53  ;;  %1690 = vset.pattern.permute.xlu0 %v1792_v53  ;;  %v555_v61 = vld [vmem:[%s2117_s1] sm:$0x3]  ;;  %v578_v62 = vsub.s32 1, %v1945_v42 }
 0x156   : > { %vm556_vm4 = vcmp.gt.f32.partialorder %v555_v61, 0.5 }
 0x157   : > { %v1933_v39 = vld [vmem:[#allocation2 + $0x8] sm:$0xff]  ;;  %1584 = vmatpush3.bf16.msra.mxu0 %v1697_v37  ;;  %v593_v46 = vrot.slane %v1949_v44, %v571_v43  ;;  %v575_v63 = vsel %vm556_vm4, 1, %v1792_v53  ;;  %v572_v0 = vrot.slane %v555_v61, %v571_v43 }
 0x158   : > { %v585_v40 = vpack.c.bf16 %v1933_v39, %v1931_v38  ;;  %1589 = vmatprep.subr.bf16.mxu0 %v1788_v36  ;;  %v579_v1 = vrot.slane %v575_v63, %v578_v62 }
 0x15a   : > { %1586 = vmatmul.mubr.msk.bf16.vlgmr.msra.gmra.mxu0 %vm606_vm2, %v585_v40  ;;  %vm580_vm5 = vcmp.eq.s32.totalorder %v579_v1, 1 }
 0x15b   : > { %1591 = vmatprep.mubr.msk.bf16.mxu0 %vm1789_vm1, %v1788_v36 }
 0x21a   : > { %v644_v45 = vpop.f32.mrf.mxu0 }
 0x21b   : > { %v645_v49 = vadd.f32 %v644_v45, %v593_v46 }
 0x21c   : > { %v1587_v47 = vpop.f32.mrf.mxu0 }
 0x21e   : > { %v647_v48 = vpop.f32.mrf.mxu0 }
 0x21f   : > { %v648_v50 = vadd.f32 %v647_v48, %v593_v46 }
 0x220   : > { %v1588_v51 = vpop.f32.mrf.mxu0 }
 0x221   : > { %v1952_v52 = vpack.c.bf16 %v648_v50, %v645_v49 }
 0x223   : > { %777 = vrot.lane.b32.xlu1 %v1952_v52, %s1790_s27  ;;  %653 = vrot.lane.b32.xlu0 %v1952_v52, %s1791_s29 }
 0x227   : > { %779 = vrot.lane.b32.xlu0 %v1952_v52, %s1793_s22  ;;  %561 = vperm.xlu1 %1689, %v557_v54  }
 0x22b   : > { %566 = vperm.xlu0 %1690, %v558_v55  }
 0x295   : > { %v654_v56 = vpop.permute.xlu0 %653  ;;  %v778_v60 = vpop.permute.xlu1 %777 }
 0x296   : > { %v660_v57 = vsel %vm655_vm3, %v654_v56, 0 }
 0x297   : > { %1590 = vmatpush3.bf16.xpose.msra.mxu0 %v660_v57 }
 0x298   : > { %1595 = vmatprep.subr.bf16.mxu0 %v1788_v36 }
 0x299   : > { %v780_v58 = vpop.permute.xlu0 %779 }
 0x29a   : > { %v785_v59 = vsel %vm655_vm3, %v780_v58, 0 }
 0x29b   : > { %1602 = vmatpush3.bf16.xpose.msra.mxu1 %v785_v59 }
 0x29c   : > { %1613 = vmatprep.subr.bf16.mxu1 %v1788_v36 }
 0x29e   : > { %1592 = vmatmul.mubr.msk.bf16.vlgmr.msra.gmra.mxu0 %vm655_vm3, %v1952_v52 }
 0x29f   : > { %1597 = vmatprep.mubr.msk.bf16.mxu0 %vm1789_vm1, %v1788_v36 }
 0x2a2   : > { %1604 = vmatmul.mubr.msk.bf16.vlgmr.msra.gmra.mxu1 %vm655_vm3, %v778_v60  ;;  %v562_v2 = vpop.permute.xlu1 %561 }
 0x2a3   : > { %1617 = vmatprep.mubr.msk.bf16.mxu1 %vm1789_vm1, %v1788_v36  ;;  %vm573_vm6 = vcmp.eq.f32.partialorder %v562_v2, %v572_v0 }
 0x2a4   : > { %vm581_vm7 = vmand %vm573_vm6, %vm580_vm5 }
 0x2a5   : > { %v583_v5 = vsel %vm581_vm7, 0.0, %v1794_v4 }
 0x2a6   : > { %v567_v3 = vpop.permute.xlu0 %566 }
 0x2a7   : > { %vm574_vm8 = vcmp.eq.f32.partialorder %v567_v3, %v572_v0 }
 0x2a8   : > { %vm582_vm9 = vmand %vm574_vm8, %vm580_vm5 }
 0x2a9   : > { %v584_v10 = vsel %vm582_vm9, 0.0, %v1794_v4 }
 0x35e   : > { %v696_v6 = vpop.f32.mrf.mxu0 }
 0x35f   : > { %v703_v7 = vmul.f32 0.25, %v696_v6  ;;  %v1698_v6 = vld [vmem:[%s1892_s18 + $0x8] sm:$0xff]  }
 0x360   : > { %v1593_v8 = vpop.f32.mrf.mxu0  ;;  %1614 = vmatpush3.bf16.msra.mxu1 %v1698_v6  ;;  %v1703_v6 = vld [vmem:[%s1902_s24 + $0x30] sm:$0xff]  }
 0x361   : > { %v705_v9 = vadd.f32 %v703_v7, %v583_v5  ;;  %1615 = vmatprep.subr.bf16.mxu1 %v1788_v36 }
 0x362   : > { %v699_v11 = vpop.f32.mrf.mxu0  ;;  %v821_v12 = vpop.f32.mrf.mxu1 }
 0x363   : > { %v704_v13 = vmul.f32 0.25, %v699_v11  ;;  %v828_v14 = vmul.f32 0.25, %v821_v12  ;;  %v707_v15 = vsel %vm655_vm3, %v705_v9, -inf }
 0x364   : > { %v1605_v16 = vpop.f32.mrf.mxu1  ;;  %708 = vmax.xlane.f32.xlu1 %v707_v15  ;;  %v1594_v17 = vpop.f32.mrf.mxu0 }
 0x365   : > { %v830_v18 = vadd.f32 %v828_v14, %v583_v5  ;;  %v706_v19 = vadd.f32 %v704_v13, %v584_v10 }
 0x366   : > { %v824_v20 = vpop.f32.mrf.mxu1 }
 0x367   : > { %v829_v21 = vmul.f32 0.25, %v824_v20  ;;  %v832_v22 = vsel %vm655_vm3, %v830_v18, -inf  ;;  %v710_v23 = vsel %vm655_vm3, %v706_v19, -inf }
 0x368   : > { %v1606_v24 = vpop.f32.mrf.mxu1  ;;  %833 = vmax.xlane.f32.xlu1 %v832_v22  ;;  %711 = vmax.xlane.f32.xlu0 %v710_v23  ;;  %v920_v23 = vrot.slane %v1949_v44, %v578_v62 }
 0x369   : > { %v831_v25 = vadd.f32 %v829_v21, %v584_v10 }
 0x36b   : > { %v835_v26 = vsel %vm655_vm3, %v831_v25, -inf }
 0x36c   : > { %836 = vmax.xlane.f32.xlu0 %v835_v26 }
 0x3ed   : > { %v709_v27 = vpop.xlane.xlu1 %708 }
 0x3ee   : > { %v713_v28 = vsub.f32 %v705_v9, %v709_v27  ;;  %v1699_v9 = vld [vmem:[%s1892_s18] sm:$0xff]  }
 0x3ef   : > { %1616 = vmatpush3.bf16.msra.mxu1 %v1699_v9  ;;  %v1706_v9 = vld [vmem:[%s1902_s24 + $0x18] sm:$0xff]  }
 0x3f0   : > { %v715_v29 = vmul.f32 1.442695, %v713_v28  ;;  %1629 = vmatprep.subr.bf16.mxu1 %v1788_v36 }
 0x3f1   : > { %v834_v30 = vpop.xlane.xlu1 %833  ;;  %v712_v31 = vpop.xlane.xlu0 %711 }
 0x3f2   : > { %1710 = vpow2.f32 %v715_v29  ;;  %v838_v32 = vsub.f32 %v830_v18, %v834_v30  ;;  %v714_v33 = vsub.f32 %v706_v19, %v712_v31 }
 0x3f4   : > { %v840_v34 = vmul.f32 1.442695, %v838_v32  ;;  %v717_v35 = vmul.f32 1.442695, %v714_v33 }
 0x3f5   : > { %v837_v37 = vpop.xlane.xlu0 %836 }
 0x3f6   : > { %1712 = vpow2.f32 %v840_v34  ;;  %v839_v40 = vsub.f32 %v831_v25, %v837_v37 }
 0x3f7   : > { %1714 = vpow2.f32 %v717_v35 }
 0x3f8   : > { %v842_v43 = vmul.f32 1.442695, %v839_v40 }
 0x3fa   : > { %1716 = vpow2.f32 %v842_v43 }
 0x3ff   : > { %v1711_v45 = vpop.eup %1710 }
 0x400   : > { %v719_v46 = vsel %vm655_vm3, %v1711_v45, 0.0 }
 0x401   : > { %720 = vadd.xlane.f32.xlu1 %v719_v46 }
 0x403   : > { %v1713_v47 = vpop.eup %1712 }
 0x404   : > { %v1715_v48 = vpop.eup %1714  ;;  %v844_v49 = vsel %vm655_vm3, %v1713_v47, 0.0 }
 0x405   : > { %845 = vadd.xlane.f32.xlu1 %v844_v49  ;;  %v722_v50 = vsel %vm655_vm3, %v1715_v48, 0.0 }
 0x406   : > { %723 = vadd.xlane.f32.xlu0 %v722_v50 }
 0x407   : > { %v1717_v51 = vpop.eup %1716 }
 0x408   : > { %v847_v53 = vsel %vm655_vm3, %v1717_v51, 0.0 }
 0x40a   : > { %848 = vadd.xlane.f32.xlu0 %v847_v53 }
 0x416   : > { %730 = vrot.lane.b32.xlu1 %v1952_v52, %s1795_s17 }
 0x420   : > { %855 = vrot.lane.b32.xlu0 %v1952_v52, %s1796_s28 }
 0x48a   : > { %v721_v54 = vpop.xlane.xlu1 %720 }
 0x48b   : > { %1718 = vrcp.f32 %v721_v54 }
 0x48e   : > { %v846_v55 = vpop.xlane.xlu1 %845 }
 0x48f   : > { %v724_v56 = vpop.xlane.xlu0 %723 }
 0x490   : > { %1720 = vrcp.f32 %v724_v56  ;;  %v1008_v56 = vsub.s32 2, %v1945_v42 }
 0x492   : > { %v731_v57 = vpop.permute.xlu1 %730 }
 0x493   : > { %v849_v58 = vpop.xlane.xlu0 %848  ;;  %1596 = vmatpush3.bf16.msra.mxu0 %v731_v57 }
 0x494   : > { %1722 = vrcp.f32 %v849_v58  ;;  %1607 = vmatprep.subr.bf16.mxu0 %v1788_v36 }
 0x495   : > { %1724 = vrcp.f32 %v846_v55 }
 0x497   : > { %v856_v52 = vpop.permute.xlu0 %855 }
 0x498   : > { %v1719_v59 = vpop.eup %1718 }
 0x499   : > { %v727_v61 = vmul.f32 %v1719_v59, %v1711_v45  ;;  %v1009_v59 = vrot.slane %v1949_v44, %v1008_v56 }
 0x49d   : > { %v1721_v60 = vpop.eup %1720 }
 0x49e   : > { %v728_v63 = vmul.f32 %v1721_v60, %v1715_v48  ;;  %v1700_v48 = vld [vmem:[%s1897_s21 + $0x8] sm:$0xff]   ;;  %v1014_v60 = vsub.s32 3, %v1945_v42 }
 0x4a0   : > { %v729_v0 = vpack.c.bf16 %v728_v63, %v727_v61 }
 0x4a1   : > { %v1723_v1 = vpop.eup %1722 }
 0x4a2   : > { %1598 = vmatmul.mubr.msk.bf16.vlgmr.msra.gmra.mxu0 %vm655_vm3, %v729_v0  ;;  %v1725_v2 = vpop.eup %1724  ;;  %v853_v3 = vmul.f32 %v1723_v1, %v1717_v51  ;;  %v1015_v1 = vrot.slane %v1949_v44, %v1014_v60 }
 0x4a3   : > { %1608 = vmatpush3.bf16.msra.mxu0 %v856_v52  ;;  %1609 = vmatprep.mubr.msk.bf16.mxu0 %vm1789_vm1, %v1788_v36  ;;  %v852_v4 = vmul.f32 %v1725_v2, %v1713_v47 }
 0x4a4   : > { %1621 = vmatprep.subr.bf16.mxu0 %v1788_v36 }
 0x4a5   : > { %v854_v5 = vpack.c.bf16 %v853_v3, %v852_v4 }
 0x4aa   : > { %1610 = vmatmul.mubr.msk.bf16.vlgmr.msra.gmra.mxu0 %vm655_vm3, %v854_v5  ;;  %v1702_v5 = vld [vmem:[%s1902_s24 + $0x38] sm:$0xff]  }
 0x4ab   : > { %1625 = vmatprep.mubr.msk.bf16.mxu0 %vm1789_vm1, %v1788_v36  ;;  %1622 = vmatpush3.bf16.msra.mxu0 %v1700_v48 }
 0x4ac   : > { %1623 = vmatprep.subr.bf16.mxu0 %v1788_v36 }
 0x562   : > { %v770_v7 = vpop.f32.mrf.mxu0 }
 0x564   : > { %v1599_v8 = vpop.f32.mrf.mxu0 }
 0x565   : > { %v1705_v8 = vld [vmem:[%s1902_s24 + $0x20] sm:$0xff]  }
 0x566   : > { %v773_v10 = vpop.f32.mrf.mxu0 }
 0x568   : > { %v1600_v11 = vpop.f32.mrf.mxu0 }
 0x569   : > { %v1708_v11 = vld [vmem:[%s1902_s24 + $0x8] sm:$0xff]  }
 0x56a   : > { %v895_v12 = vpop.f32.mrf.mxu0 }
 0x56c   : > { %v1611_v13 = vpop.f32.mrf.mxu0 }
 0x56d   : > { %v1025_v13 = vsub.s32 4, %v1945_v42 }
 0x56e   : > { %v898_v14 = vpop.f32.mrf.mxu0 }
 0x56f   : > { %v1691_v15 = vpack.i.bf16 %v898_v14, %v895_v12  ;;  %v1709_v12 = vld [vmem:[%s1902_s24] sm:$0xff]   ;;  %v1026_v14 = vrot.slane %v1949_v44, %v1025_v13 }
 0x570   : > { %v1612_v16 = vpop.f32.mrf.mxu0 }
 0x571   : > { %1692 = vrot.lane.b32.xlu1 %v1691_v15, %s1797_s19 }
 0x5e3   : > { %v1693_v17 = vpop.permute.xlu1 %1692 }
 0x5e4   : > { %v1695_v18 = vunpack.i.h.bf16 %v1693_v17  ;;  %v1694_v19 = vunpack.i.l.bf16 %v1693_v17 }
 0x5e6   : > { %v911_v20 = vsel %vm655_vm3, %v773_v10, %v1695_v18  ;;  %v910_v21 = vsel %vm655_vm3, %v770_v7, %v1694_v19  ;;  %v1704_v7 = vld [vmem:[%s1902_s24 + $0x28] sm:$0xff]   ;;  %v1707_v10 = vld [vmem:[%s1902_s24 + $0x10] sm:$0xff]  }
 0x5e7   : > { %v912_v22 = vpack.c.bf16 %v911_v20, %v910_v21 }
 0x5e9   : > { %1618 = vmatmul.mubr.msk.bf16.vlgmr.msra.gmra.mxu1 %vm606_vm2, %v912_v22 }
 0x5ea   : > { %1645 = vmatprep.mubr.msk.bf16.mxu1 %vm1789_vm1, %v1788_v36  ;;  %1630 = vmatpush3.bf16.msra.mxu1 %v1702_v5 }
 0x5eb   : > { %1631 = vmatprep.subr.bf16.mxu1 %v1788_v36 }
 0x5ee   : > { %1632 = vmatpush3.bf16.msra.mxu1 %v1703_v6 }
 0x5ef   : > { %1633 = vmatprep.subr.bf16.mxu1 %v1788_v36 }
 0x5f2   : > { %1634 = vmatpush3.bf16.msra.mxu1 %v1704_v7  ;;  %v1241_v7 = vsub.s32 6, %v1945_v42 }
 0x5f3   : > { %1635 = vmatprep.subr.bf16.mxu1 %v1788_v36 }
 0x5f6   : > { %1636 = vmatpush3.bf16.msra.mxu1 %v1705_v8  ;;  %v1247_v8 = vsub.s32 7, %v1945_v42 }
 0x5f7   : > { %1637 = vmatprep.subr.bf16.mxu1 %v1788_v36 }
 0x5fa   : > { %1638 = vmatpush3.bf16.msra.mxu1 %v1706_v9  ;;  %v1242_v9 = vrot.slane %v1949_v44, %v1241_v7 }
 0x5fb   : > { %1639 = vmatprep.subr.bf16.mxu1 %v1788_v36 }
 0x5fe   : > { %1640 = vmatpush3.bf16.msra.mxu1 %v1707_v10 }
 0x5ff   : > { %1641 = vmatprep.subr.bf16.mxu1 %v1788_v36 }
 0x602   : > { %1642 = vmatpush3.bf16.msra.mxu1 %v1708_v11  ;;  %v1248_v11 = vrot.slane %v1949_v44, %v1247_v8 }
 0x603   : > { %1643 = vmatprep.subr.bf16.mxu1 %v1788_v36 }
 0x606   : > { %1644 = vmatpush3.bf16.msra.mxu1 %v1709_v12 }
 0x6a9   : > { %v970_v24 = vpop.f32.mrf.mxu1 }
 0x6aa   : > { %v971_v25 = vadd.f32 %v970_v24, %v920_v23 }
 0x6ab   : > { %v1619_v26 = vpop.f32.mrf.mxu1 }
 0x6ac   : > { %v977_v27 = vadd.f32 %v971_v25, %v1931_v38 }
 0x6ad   : > { %v973_v28 = vpop.f32.mrf.mxu1 }
 0x6ae   : > { %v974_v29 = vadd.f32 %v973_v28, %v920_v23  ;;  %v979_v30 = vsel %vm606_vm2, %v977_v27, 0.0 }
 0x6af   : > { %980 = vadd.xlane.f32.xlu1 %v979_v30  ;;  %v1620_v31 = vpop.f32.mrf.mxu1 }
 0x6b0   : > { %v978_v32 = vadd.f32 %v974_v29, %v1933_v39  ;;  %v1701_v39 = vld [vmem:[%s1897_s21] sm:$0xff]  }
 0x6b1   : > { %1624 = vmatpush3.bf16.msra.mxu0 %v1701_v39 }
 0x6b2   : > { %v982_v33 = vsel %vm606_vm2, %v978_v32, 0.0 }
 0x6b3   : > { %983 = vadd.xlane.f32.xlu0 %v982_v33 }
 0x738   : > { %v981_v34 = vpop.xlane.xlu1 %980 }
 0x739   : > { %v986_v62 = vmul.f32 0.03125, %v981_v34 }
 0x73b   : > { %v988_v35 = vsub.f32 %v977_v27, %v986_v62 }
 0x73c   : > { %v984_v37 = vpop.xlane.xlu0 %983 }
 0x73d   : > { %v987_v40 = vmul.f32 0.03125, %v984_v37  ;;  %v990_v43 = vmul.f32 %v988_v35, %v988_v35 }
 0x73f   : > { %v989_v38 = vsub.f32 %v978_v32, %v987_v40  ;;  %v992_v45 = vsel %vm606_vm2, %v990_v43, 0.0  ;;  %v1120_v43 = vsub.s32 5, %v1945_v42 }
 0x740   : > { %993 = vadd.xlane.f32.xlu0 %v992_v45 }
 0x741   : > { %v991_v46 = vmul.f32 %v989_v38, %v989_v38 }
 0x743   : > { %v995_v47 = vsel %vm606_vm2, %v991_v46, 0.0 }
 0x744   : > { %996 = vadd.xlane.f32.xlu1 %v995_v47 }
 0x7c9   : > { %v994_v49 = vpop.xlane.xlu0 %993 }
 0x7ca   : > { %v998_v50 = vmul.f32 0.03125, %v994_v49 }
 0x7cc   : > { %v1000_v51 = vadd.f32 1e-12, %v998_v50 }
 0x7cd   : > { %v997_v53 = vpop.xlane.xlu1 %996 }
 0x7ce   : > { %1726 = vrsqrt.f32 %v1000_v51  ;;  %v999_v54 = vmul.f32 0.03125, %v997_v53 }
 0x7d0   : > { %v1001_v55 = vadd.f32 1e-12, %v999_v54 }
 0x7d2   : > { %1728 = vrsqrt.f32 %v1001_v55 }
 0x7db   : > { %v1727_v57 = vpop.eup %1726 }
 0x7dc   : > { %v1004_v58 = vmul.f32 %v1727_v57, %v988_v35 }
 0x7de   : > { %v1010_v0 = vmul.f32 %v1009_v59, %v1004_v58 }
 0x7df   : > { %v1729_v61 = vpop.eup %1728 }
 0x7e0   : > { %v1005_v63 = vmul.f32 %v1729_v61, %v989_v38  ;;  %v1016_v2 = vadd.f32 %v1015_v1, %v1010_v0  ;;  %v1121_v38 = vrot.slane %v1949_v44, %v1120_v43 }
 0x7e2   : > { %v1011_v52 = vmul.f32 %v1009_v59, %v1005_v63 }
 0x7e4   : > { %v2023_v3 = vadd.f32 %v1015_v1, %v1011_v52 }
 0x7e6   : > { %v1018_v4 = vpack.c.bf16 %v2023_v3, %v1016_v2 }
 0x7e8   : > { %1626 = vmatmul.mubr.msk.bf16.vlgmr.msra.gmra.mxu0 %vm606_vm2, %v1018_v4 }
 0x8a8   : > { %v1076_v15 = vpop.f32.mrf.mxu0 }
 0x8a9   : > { %v1077_v16 = vadd.f32 %v1076_v15, %v1026_v14 }
 0x8aa   : > { %v1627_v17 = vpop.f32.mrf.mxu0 }
 0x8ab   : > { %v1083_v18 = vmul.f32 %v1077_v16, %v1077_v16 }
 0x8ac   : > { %v1079_v19 = vpop.f32.mrf.mxu0 }
 0x8ad   : > { %v1085_v20 = vmul.f32 %v1083_v18, %v1077_v16  ;;  %v1080_v21 = vadd.f32 %v1079_v19, %v1026_v14 }
 0x8ae   : > { %v1628_v22 = vpop.f32.mrf.mxu0 }
 0x8af   : > { %v1087_v23 = vmul.f32 0.044715, %v1085_v20  ;;  %v1084_v24 = vmul.f32 %v1080_v21, %v1080_v21 }
 0x8b1   : > { %v1089_v25 = vadd.f32 %v1087_v23, %v1077_v16  ;;  %v1086_v26 = vmul.f32 %v1084_v24, %v1080_v21 }
 0x8b3   : > { %v1091_v27 = vmul.f32 0.7978846, %v1089_v25  ;;  %v1088_v36 = vmul.f32 0.044715, %v1086_v26 }
 0x8b5   : > { %1730 = vtanh.f32 %v1091_v27  ;;  %v1090_v28 = vadd.f32 %v1088_v36, %v1080_v21 }
 0x8b7   : > { %v1092_v29 = vmul.f32 0.7978846, %v1090_v28 }
 0x8b9   : > { %1732 = vtanh.f32 %v1092_v29 }
 0x8c2   : > { %v1731_v30 = vpop.eup %1730 }
 0x8c3   : > { %v1095_v31 = vadd.f32 1.0, %v1731_v30 }
 0x8c5   : > { %v1097_v33 = vmul.f32 0.5, %v1095_v31 }
 0x8c6   : > { %v1733_v32 = vpop.eup %1732 }
 0x8c7   : > { %v1096_v34 = vadd.f32 1.0, %v1733_v32  ;;  %v1099_v35 = vmul.f32 %v1097_v33, %v1077_v16 }
 0x8c9   : > { %v1098_v62 = vmul.f32 0.5, %v1096_v34 }
 0x8cb   : > { %v1100_v37 = vmul.f32 %v1098_v62, %v1080_v21 }
 0x8cd   : > { %v1101_v40 = vpack.c.bf16 %v1100_v37, %v1099_v35 }
 0x8cf   : > { %1646 = vmatmul.mubr.bf16.vlgmr.msra.gmra.mxu1 %v1101_v40 }
 0x98f   : > { %v1204_v45 = vpop.f32.mrf.mxu1 }
 0x990   : > { %v1205_v46 = vadd.f32 %v1204_v45, %v1121_v38 }
 0x991   : > { %v1647_v47 = vpop.f32.mrf.mxu1 }
 0x992   : > { %v1211_v48 = vadd.f32 %v1205_v46, %v1016_v2 }
 0x993   : > { %v1207_v39 = vpop.f32.mrf.mxu1 }
 0x994   : > { %v1208_v49 = vadd.f32 %v1207_v39, %v1121_v38  ;;  %v1213_v50 = vsel %vm606_vm2, %v1211_v48, 0.0 }
 0x995   : > { %1214 = vadd.xlane.f32.xlu0 %v1213_v50  ;;  %v1648_v51 = vpop.f32.mrf.mxu1 }
 0x996   : > { %v1212_v53 = vadd.f32 %v1208_v49, %v2023_v3 }
 0x998   : > { %v1216_v54 = vsel %vm606_vm2, %v1212_v53, 0.0 }
 0x999   : > { %1217 = vadd.xlane.f32.xlu1 %v1216_v54 }
 0xa1e   : > { %v1215_v55 = vpop.xlane.xlu0 %1214 }
 0xa1f   : > { %v1219_v56 = vmul.f32 0.03125, %v1215_v55 }
 0xa21   : > { %v1221_v57 = vsub.f32 %v1211_v48, %v1219_v56 }
 0xa22   : > { %v1218_v58 = vpop.xlane.xlu1 %1217 }
 0xa23   : > { %v1220_v59 = vmul.f32 0.03125, %v1218_v58  ;;  %v1223_v60 = vmul.f32 %v1221_v57, %v1221_v57 }
 0xa25   : > { %v1222_v61 = vsub.f32 %v1212_v53, %v1220_v59  ;;  %v1225_v63 = vsel %vm606_vm2, %v1223_v60, 0.0 }
 0xa26   : > { %1226 = vadd.xlane.f32.xlu0 %v1225_v63 }
 0xa27   : > { %v1224_v0 = vmul.f32 %v1222_v61, %v1222_v61 }
 0xa29   : > { %v1228_v1 = vsel %vm606_vm2, %v1224_v0, 0.0 }
 0xa2a   : > { %1229 = vadd.xlane.f32.xlu1 %v1228_v1 }
 0xaaf   : > { %v1227_v52 = vpop.xlane.xlu0 %1226 }
 0xab0   : > { %v1231_v2 = vmul.f32 0.03125, %v1227_v52 }
 0xab2   : > { %v1233_v3 = vadd.f32 1e-12, %v1231_v2 }
 0xab3   : > { %v1230_v4 = vpop.xlane.xlu1 %1229 }
 0xab4   : > { %1734 = vrsqrt.f32 %v1233_v3  ;;  %v1232_v5 = vmul.f32 0.03125, %v1230_v4 }
 0xab6   : > { %v1234_v6 = vadd.f32 1e-12, %v1232_v5 }
 0xab8   : > { %1736 = vrsqrt.f32 %v1234_v6 }
 0xac1   : > { %v1735_v10 = vpop.eup %1734 }
 0xac2   : > { %v1237_v12 = vmul.f32 %v1735_v10, %v1221_v57 }
 0xac4   : > { %v1243_v13 = vmul.f32 %v1242_v9, %v1237_v12 }
 0xac5   : > { %v1737_v14 = vpop.eup %1736 }
 0xac6   : > { %v1249_v15 = vadd.f32 %v1248_v11, %v1243_v13  ;;  %v1238_v16 = vmul.f32 %v1737_v14, %v1222_v61 }
 0xac8   : > { %1251 = vst.msk [vmem:[#allocation2] sm:$0xff] %vm606_vm2, %v1249_v15  ;;  %v1244_v17 = vmul.f32 %v1242_v9, %v1238_v16  ;;  %1256 = sbr.rel (%p1537_p5) target bundleno = 3307 (0xceb), region = 76 }
 0xaca   : > { %v1250_v18 = vadd.f32 %v1248_v11, %v1244_v17 }
 0xacc   : > { %1252 = vst.msk [vmem:[#allocation2 + $0x8] sm:$0xff] %vm606_vm2, %v1250_v18 }
 0xacd   : > { %v1740_v42 = vld [vmem:[%s2125_s9 + $0x8] sm:$0xff]   ;;  %v1798_v19 = vmov 0.0   ;;  %v1741_v44 = vld [vmem:[%s2125_s9] sm:$0xff]   ;;  %vm1799_vm10 = vmmov 0   ;;  %vm1374_vm11 = vcmask 7168   ;;  %v1800_v22 = vmov 0  }
 0xace   : > { %1649 = vmatprep.subr.bf16.mxu0 %v1798_v19  ;;  %1653 = vmatprep.mubr.msk.bf16.mxu0 %vm1799_vm10, %v1798_v19  ;;  %v2067_v20 = vld [vmem:[%s2127_s11] sm:$0xff]  ;;  %v2072_v21 = vld [vmem:[%s2127_s11 + $0x8] sm:$0xff]  ;;  %v1257_v25 = vpack.c.bf16 %v1250_v18, %v1249_v15  ;;  %v1328_v28 = vand.u32 127, %v569_v41  ;;  %vm1400_vm1 = vcmask 0  }
 0xacf   : > { %1650 = vmatpush3.bf16.msra.mxu0 %v1740_v42  ;;  %1738 = vset.pattern.permute.xlu1 %v1800_v22  ;;  %vm1368_vm12 = vcmp.ne.s32.totalorder %v2067_v20, 4294967196  ;;  %vm1369_vm13 = vcmp.ne.s32.totalorder %v2072_v21, 4294967196  ;;  %v1538_v29 = vld [vmem:[%s2126_s10] ss:$0 sm:$0xff] }
 0xad0   : > { %1651 = vmatprep.subr.bf16.mxu0 %v1798_v19  ;;  %1355 = vperm.xlu1 %1738, %v2067_v20   ;;  %v1542_v23 = vsel %vm1368_vm12, 1.0, %v1798_v19  ;;  %v1543_v24 = vsel %vm1369_vm13, 1.0, %v1798_v19  ;;  %vm1329_vm14 = vcmp.lt.s32.totalorder %v1328_v28, 5 }
 0xad1   : > { %1739 = vset.pattern.permute.xlu0 %v1800_v22  ;;  %v1388_v26 = vsel %vm1374_vm11, %v1542_v23, 0.0  ;;  %v1389_v27 = vsel %vm1374_vm11, %v1543_v24, 0.0 }
 0xad2   : > { %v1390_v36 = vadd.f32 %v1389_v27, %v1388_v26 }
 0xad3   : > { %1652 = vmatpush3.bf16.msra.mxu0 %v1741_v44 }
 0xad4   : > { %1358 = vperm.xlu1 %1738, %v2072_v21   ;;  %v1391_v53 = vrot.slane %v1390_v36, 4 }
 0xad6   : > { %1654 = vmatmul.mubr.msk.bf16.vlgmr.msra.gmra.mxu0 %vm606_vm2, %v1257_v25  ;;  %v1392_v55 = vadd.f32 %v1391_v53, %v1390_v36 }
 0xad8   : > { %v1393_v57 = vrot.slane %v1392_v55, 2 }
 0xada   : > { %v1394_v58 = vadd.f32 %v1393_v57, %v1392_v55 }
 0xadc   : > { %v1395_v59 = vrot.slane %v1394_v58, 1 }
 0xade   : > { %v1396_v0 = vadd.f32 %v1395_v59, %v1394_v58 }
 0xae0   : > { %v1397_v4 = vmax.f32 %v1396_v0, 1.0 }
 0xb4b   : > { %v1356_v47 = vpop.permute.xlu1 %1355 }
 0xb4c   : > { %vm1360_vm15 = vcmp.eq.s32.totalorder %v1328_v28, %v1356_v47 }
 0xb4f   : > { %v1359_v39 = vpop.permute.xlu1 %1358 }
 0xb50   : > { %vm1361_vm0 = vcmp.eq.s32.totalorder %v1328_v28, %v1359_v39 }
 0xb96   : > { %v1318_v30 = vpop.f32.mrf.mxu0 }
 0xb97   : > { %v1319_v31 = vadd.f32 %v1538_v29, %v1318_v30 }
 0xb98   : > { %v1655_v32 = vpop.f32.mrf.mxu0 }
 0xb99   : > { %1325 = vst [vmem:[%s2128_s12] sm:$0xff] %v1319_v31  ;;  %v1330_v33 = vsel %vm1329_vm14, %v1319_v31, -1e+09 }
 0xb9a   : > { %1332 = vmax.xlane.f32.xlu0 %v1330_v33  ;;  %v1321_v34 = vpop.f32.mrf.mxu0  ;;  %v1362_v50 = vsel %vm1360_vm15, %v1330_v33, 0.0 }
 0xb9b   : > { %v1322_v62 = vadd.f32 %v1538_v29, %v1321_v34 }
 0xb9c   : > { %v1656_v35 = vpop.f32.mrf.mxu0 }
 0xb9d   : > { %1326 = vst [vmem:[%s2128_s12 + $0x8] sm:$0xff] %v1322_v62  ;;  %v1331_v41 = vsel %vm1329_vm14, %v1322_v62, -1e+09 }
 0xb9e   : > { %1334 = vmax.xlane.f32.xlu0 %v1331_v41  ;;  %v1363_v51 = vsel %vm1361_vm0, %v1331_v41, 0.0 }
 0xc23   : > { %v1333_v37 = vpop.xlane.xlu0 %1332 }
 0xc24   : > { %v1336_v40 = vsub.f32 %v1330_v33, %v1333_v37 }
 0xc26   : > { %v1338_v43 = vmul.f32 1.442695, %v1336_v40 }
 0xc27   : > { %v1335_v38 = vpop.xlane.xlu0 %1334 }
 0xc28   : > { %1742 = vpow2.f32 %v1338_v43  ;;  %v1337_v45 = vsub.f32 %v1331_v41, %v1335_v38 }
 0xc2a   : > { %v1340_v46 = vmul.f32 1.442695, %v1337_v45 }
 0xc2c   : > { %1744 = vpow2.f32 %v1340_v46 }
 0xc35   : > { %v1743_v48 = vpop.eup %1742 }
 0xc36   : > { %1342 = vadd.xlane.f32.xlu0 %v1743_v48 }
 0xc39   : > { %v1745_v49 = vpop.eup %1744 }
 0xc3a   : > { %1364 = vadd.xlane.f32.xlu0 %v1362_v50  ;;  %1344 = vadd.xlane.f32.xlu1 %v1745_v49 }
 0xc3e   : > { %1366 = vadd.xlane.f32.xlu0 %v1363_v51 }
 0xcbf   : > { %v1343_v54 = vpop.xlane.xlu0 %1342 }
 0xcc0   : > { %1746 = vlog2.f32 %v1343_v54 }
 0xcc3   : > { %v1345_v56 = vpop.xlane.xlu1 %1344  ;;  %v1365_v63 = vpop.xlane.xlu0 %1364 }
 0xcc4   : > { %1748 = vlog2.f32 %v1345_v56 }
 0xcc5   : > { %1750 = vrcp.f32 %v1397_v4 }
 0xcc7   : > { %v1367_v6 = vpop.xlane.xlu0 %1366 }
 0xccd   : > { %v1747_v60 = vpop.eup %1746 }
 0xcce   : > { %v1347_v61 = vmul.f32 0.6931472, %v1747_v60 }
 0xcd0   : > { %v1350_v1 = vadd.f32 %v1347_v61, %v1333_v37 }
 0xcd1   : > { %v1749_v52 = vpop.eup %1748 }
 0xcd2   : > { %v1349_v2 = vmul.f32 0.6931472, %v1749_v52  ;;  %v1370_v3 = vsub.f32 %v1350_v1, %v1365_v63  ;;  %v1751_v18 = vpop.eup %1750 }
 0xcd4   : > { %v1351_v5 = vadd.f32 %v1349_v2, %v1335_v38  ;;  %v1372_v7 = vsel %vm1368_vm12, %v1370_v3, 0.0 }
 0xcd5   : > { %v1375_v10 = vsel %vm1374_vm11, %v1372_v7, 0.0 }
 0xcd6   : > { %v1371_v8 = vsub.f32 %v1351_v5, %v1367_v6 }
 0xcd8   : > { %v1373_v9 = vsel %vm1369_vm13, %v1371_v8, 0.0 }
 0xcd9   : > { %v1376_v11 = vsel %vm1374_vm11, %v1373_v9, 0.0 }
 0xcda   : > { %v1377_v12 = vadd.f32 %v1376_v11, %v1375_v10 }
 0xcdc   : > { %v1378_v13 = vrot.slane %v1377_v12, 4 }
 0xcde   : > { %v1379_v14 = vadd.f32 %v1378_v13, %v1377_v12 }
 0xce0   : > { %v1380_v15 = vrot.slane %v1379_v14, 2 }
 0xce2   : > { %v1381_v16 = vadd.f32 %v1380_v15, %v1379_v14 }
 0xce4   : > { %v1382_v17 = vrot.slane %v1381_v16, 1 }
 0xce6   : > { %v1383_v42 = vadd.f32 %v1382_v17, %v1381_v16 }
 0xce8   : > { %v1399_v19 = vmul.f32 %v1751_v18, %v1383_v42 }
 0xcea   : > { %1401 = vst.msk [vmem:[#allocation3] sm:$0x1] %vm1400_vm1, %v1399_v19 }
 0xceb PF: > { %p1661_p6 = scmp.eq.s32.totalorder %s1878_s26, 1  ;;  %s1801_s17 = smov [#allocation3]  }
 0xcec   : > { %s1412_s28 = sshll.u32 %s1801_s17, 4  ;;  %s1413_s28 = int_to_ptr.vmem [resolvable:$true] %s1412_s28 }
 0xced   : > { %s1752_s19 = scalar_lea.vmem %s1413_s28, 16  ;;  %s1758_s18 = scalar_lea.vmem %s1413_s28, 32 }
 0xcee   : > { %p1753_p7 = scmp.ne.s32.totalorder %s1413_s28, %s1752_s19  ;;  %p1759_p10 = scmp.lt.s32.totalorder %s1413_s28, %s1413_s28 }
 0xcef   : > { %p1760_p11 = scmp.lt.s32.totalorder %s1758_s18, %s1752_s19 }
 0xcf0   : > { %p1754_p8 = pnand %p1753_p7, %p1661_p6 }
 0xcf1   : > { %p1761_p12 = por %p1760_p11, %p1759_p10 }
 0xcf2   : > { %p1755_p9 = pneg %p1754_p8 }
 0xcf4   : > { %p1762_p13 = pnand %p1761_p12, %p1755_p9 }
 0xcf6   : > { %1765 = shalt.err (!%p1762_p13)
}
 0xcf7   : > { %s2133_s13 = sld [smem:[#allocation7_spill]] }
 0xcfd   : > { %1658 = dma.vmem_to_hbm [thread:$0]  (%p1661_p6), %s1413_s28, 16, %s2133_s13, [#allocation4]  }
 0xcfe   : > { %1781 = dma.done.wait (%p1661_p6), [#allocation4], 16  }
 0xcff   : > { %1783 = vsyncadd (%p1661_p6), [#allocation4], 4294967280 }
 0xd00 PF: > { %s2134_s25 = sld [smem:[#allocation6_spill]] }
 0xd06   : > { %s25_s25 = sadd.s32 1, %s2134_s25  }
 0xd07   : > { %p22_p0 = scmp.ge.s32.totalorder %s25_s25, 4  }
 0xd09   :  { %24 = sbr.rel (!%p22_p0) target bundleno = 3 (0x3), region = 123 }
 0xd0e   :  { %1428 = vsyncpa [#allocation4], 1 }
 0xd0f   :  { %1430 = vsyncpa [#allocation4 + $0x1], 1 }

</bundles_post_ra>
